<compile_context>
chip_gen: v5e
topology: v5e:2x2
jax: 0.10.0
libtpu: 0.0.40
codegen_flags: <defaults>
</compile_context>

<pallas_src>
import math
from functools import partial

import jax
import jax.numpy as jnp
from jax import lax
from jax.experimental import pallas as pl
from jax.experimental.pallas import tpu as pltpu

HIGH = lax.Precision.HIGHEST   # reference (plain JAX) only
NEG = -1e9                     # additive value for key-padding mask (src_mask uses -1e6)


def _mm(a, b):
    """MXU matmul: bf16 inputs, f32 accumulation."""
    return jnp.dot(a.astype(jnp.bfloat16), b.astype(jnp.bfloat16),
                   preferred_element_type=jnp.float32)


# ----------------------------- Pallas kernels -----------------------------

def _embed_kernel(prompt_ref, wp_ref, bp_ref, src_ref, wi_ref, bi_ref,
                  p_ref, v_ref):
    # sqrt(d_model) is pre-folded into wp/bp/wi/bi.
    p_ref[...] = _mm(prompt_ref[...], wp_ref[...]) + bp_ref[...]
    v_ref[...] = _mm(src_ref[...], wi_ref[...]) + bi_ref[...]


def _encoder_layer_kernel(x_ref, mask_ref,
                          w_in_ref, b_in_ref, w_out_ref, b_out_ref,
                          w1_ref, b1_ref, w2_ref, b2_ref,
                          g1_ref, be1_ref, g2_ref, be2_ref,
                          o_ref, *, n_heads, sm_scale, eps):
    # One batch element per grid step: x_ref (S, D), mask_ref (S, S) additive.
    x = x_ref[...]
    mask = mask_ref[...]
    S, D = x.shape
    Dh = D // n_heads

    def layer_norm(v, g, b):
        mu = jnp.mean(v, axis=-1, keepdims=True)
        vc = v - mu
        var = jnp.mean(vc * vc, axis=-1, keepdims=True)
        return vc * lax.rsqrt(var + eps) * g + b

    # ---- self-attention (fused QKV projection, per-head static loop) ----
    qkv = _mm(x, w_in_ref[...]) + b_in_ref[...]          # (S, 3D)
    w_out = w_out_ref[...]
    attn = jnp.zeros((S, D), jnp.float32)
    for h in range(n_heads):
        qh = qkv[:, h * Dh:(h + 1) * Dh]                  # (S, Dh)
        kh = qkv[:, D + h * Dh:D + (h + 1) * Dh]
        vh = qkv[:, 2 * D + h * Dh:2 * D + (h + 1) * Dh]
        # q @ k^T without materializing the transpose (contract last axes).
        s = lax.dot_general(qh.astype(jnp.bfloat16), kh.astype(jnp.bfloat16),
                            (((1,), (1,)), ((), ())),
                            preferred_element_type=jnp.float32)
        s = s * sm_scale + mask
        s = s - jnp.max(s, axis=-1, keepdims=True)
        p = jnp.exp(s)
        p = p * pl.reciprocal(jnp.sum(p, axis=-1, keepdims=True), approx=True)
        ah = _mm(p, vh)                                   # (S, Dh)
        # fold the output projection per head: attn += ah @ w_out[h*Dh:(h+1)*Dh, :]
        attn = attn + _mm(ah, w_out[h * Dh:(h + 1) * Dh, :])
    attn = attn + b_out_ref[...]

    # ---- add & layernorm 1 (post-norm) ----
    x1 = layer_norm(x + attn, g1_ref[...], be1_ref[...])

    # ---- feed-forward ----
    ff = jnp.maximum(_mm(x1, w1_ref[...]) + b1_ref[...], 0.0)
    ff = _mm(ff, w2_ref[...]) + b2_ref[...]

    # ---- add & layernorm 2 ----
    o_ref[...] = layer_norm(x1 + ff, g2_ref[...], be2_ref[...])


def _out_linear_kernel(x_ref, w_ref, b_ref, o_ref):
    o_ref[...] = jax.nn.sigmoid(_mm(x_ref[...], w_ref[...]) + b_ref[...])


# ----------------------------- pallas_call wrappers -----------------------------

def _full_spec(shape):
    return pl.BlockSpec(shape, lambda i: (0,) * len(shape))


def embed(prompt, wp, bp, src2, wi, bi):
    N, C = prompt.shape
    M, F = src2.shape
    D = wp.shape[1]
    return pl.pallas_call(
        _embed_kernel,
        grid=(1,),
        in_specs=[_full_spec((N, C)), _full_spec((C, D)), _full_spec((1, D)),
                  _full_spec((M, F)), _full_spec((F, D)), _full_spec((1, D))],
        out_specs=[_full_spec((N, D)), _full_spec((M, D))],
        out_shape=(jax.ShapeDtypeStruct((N, D), jnp.float32),
                   jax.ShapeDtypeStruct((M, D), jnp.float32)),
    )(prompt, wp, bp, src2, wi, bi)


def encoder_layer(x, mask, lyr, n_heads):
    # x: (N, S, D) batch-major, mask: (N, S, S) additive.
    N, S, D = x.shape
    Hd = lyr["w1"].shape[1]
    sm_scale = 1.0 / math.sqrt(D // n_heads)

    def wspec(shape):
        return pl.BlockSpec(shape, lambda n: (0,) * len(shape))

    xspec = pl.BlockSpec((None, S, D), lambda n: (n, 0, 0))
    mspec = pl.BlockSpec((None, S, S), lambda n: (n, 0, 0))

    return pl.pallas_call(
        partial(_encoder_layer_kernel, n_heads=n_heads, sm_scale=sm_scale, eps=1e-5),
        grid=(N,),
        in_specs=[xspec, mspec,
                  wspec((D, 3 * D)), wspec((1, 3 * D)),
                  wspec((D, D)), wspec((1, D)),
                  wspec((D, Hd)), wspec((1, Hd)),
                  wspec((Hd, D)), wspec((1, D)),
                  wspec((1, D)), wspec((1, D)), wspec((1, D)), wspec((1, D))],
        out_specs=xspec,
        out_shape=jax.ShapeDtypeStruct((N, S, D), jnp.float32),
        compiler_params=pltpu.CompilerParams(dimension_semantics=("parallel",)),
    )(x, mask, lyr["w_in"], lyr["b_in"], lyr["w_out"], lyr["b_out"],
      lyr["w1"], lyr["b1"], lyr["w2"], lyr["b2"],
      lyr["g1"], lyr["be1"], lyr["g2"], lyr["be2"])


def output_linear(x, w, b):
    M, D = x.shape
    F = w.shape[1]
    return pl.pallas_call(
        _out_linear_kernel,
        grid=(1,),
        in_specs=[_full_spec((M, D)), _full_spec((D, F)), _full_spec((1, F))],
        out_specs=_full_spec((M, F)),
        out_shape=jax.ShapeDtypeStruct((M, F), jnp.float32),
    )(x, w, b)


# ----------------------------- model glue (plain JAX) -----------------------------

def positional_encoding(max_len, d_model):
    position = jnp.arange(max_len, dtype=jnp.float32)[:, None]
    div_term = jnp.exp(jnp.arange(0, d_model, 2, dtype=jnp.float32) *
                       (-math.log(10000.0) / d_model))
    pe = jnp.zeros((max_len, d_model), jnp.float32)
    pe = pe.at[:, 0::2].set(jnp.sin(position * div_term))
    pe = pe.at[:, 1::2].set(jnp.cos(position * div_term))
    return pe


def generate_square_subsequent_mask(sz):
    m = jnp.tril(jnp.ones((sz, sz), jnp.float32))
    return jnp.where(m == 1.0, 0.0, -1e6).astype(jnp.float32)


def init_params(key, n_features, n_classes, d_model, n_heads, n_hidden, n_layers,
                max_len=128):
    ks = iter(jax.random.split(key, 8 + 8 * n_layers))

    def u(shape):
        return jax.random.uniform(next(ks), shape, jnp.float32, -0.1, 0.1)

    scale = math.sqrt(d_model)
    params = {
        # sqrt(d_model) folded into weights AND biases: (xW+b)*s == x(Ws)+(bs)
        "Wp": u((n_classes, d_model)) * scale, "bp": u((1, d_model)) * scale,
        "Wi": u((n_features, d_model)) * scale, "bi": u((1, d_model)) * scale,
        "Wo": u((d_model, n_features)), "bo": jnp.zeros((1, n_features), jnp.float32),
        "pe": positional_encoding(max_len, d_model),
        "layers": [],
    }
    for _ in range(n_layers):
        params["layers"].append({
            "w_in": u((d_model, 3 * d_model)), "b_in": u((1, 3 * d_model)),
            "w_out": u((d_model, d_model)), "b_out": u((1, d_model)),
            "w1": u((d_model, n_hidden)), "b1": u((1, n_hidden)),
            "w2": u((n_hidden, d_model)), "b2": u((1, d_model)),
            "g1": jnp.ones((1, d_model), jnp.float32), "be1": jnp.zeros((1, d_model), jnp.float32),
            "g2": jnp.ones((1, d_model), jnp.float32), "be2": jnp.zeros((1, d_model), jnp.float32),
        })
    return params


def forward(params, src, prompt, src_mask, padding_mask, n_heads):
    T, N, F = src.shape
    S = T + 1
    D = params["Wi"].shape[1]

    # prompt + input projections in one fused Pallas kernel (scale pre-folded)
    p, v = embed(prompt, params["Wp"], params["bp"],
                 src.reshape(T * N, F), params["Wi"], params["bi"])        # (N,D), (T*N,D)

    # layout plumbing (tiny, done once outside the layer loop): concat + PE, batch-major
    x = jnp.concatenate([p[None], v.reshape(T, N, D)], axis=0)             # (S, N, D)
    x = x + params["pe"][:S][:, None, :]                                   # PE (dropout=identity)
    x = x.transpose(1, 0, 2)                                               # (N, S, D)

    # combined additive attention mask: causal src_mask + key padding mask
    pad_add = jnp.where(padding_mask, NEG, 0.0).astype(jnp.float32)        # (N, S)
    mask = src_mask[None, :, :] + pad_add[:, None, :]                      # (N, S, S)

    # one fused Pallas kernel per encoder layer, grid over batch ("parallel")
    for lyr in params["layers"]:
        x = encoder_layer(x, mask, lyr, n_heads)

    out = output_linear(x.reshape(N * S, D), params["Wo"], params["bo"])   # (N*S, F)
    return out.reshape(N, S, F).transpose(1, 0, 2)                         # (S, N, F)


# pure-JAX f32 reference (same math, for a correctness check)
def ref_forward(params, src, prompt, src_mask, padding_mask, n_heads):
    T, N, F = src.shape
    S = T + 1
    D = params["Wi"].shape[1]
    H = n_heads
    Dh = D // H

    def lin(x, w, b):
        return jnp.dot(x, w, precision=HIGH) + b

    def ln(x, g, b):
        m = jnp.mean(x, -1, keepdims=True)
        xc = x - m
        var = jnp.mean(xc * xc, -1, keepdims=True)
        return xc * lax.rsqrt(var + 1e-5) * g + b

    p = lin(prompt, params["Wp"], params["bp"])          # scale already folded into weights
    v = lin(src.reshape(T * N, F), params["Wi"], params["bi"])
    x = jnp.concatenate([p[None], v.reshape(T, N, D)], 0)
    x = (x + params["pe"][:S][:, None, :]).reshape(S * N, D)

    pad_add = jnp.where(padding_mask, NEG, 0.0).astype(jnp.float32)
    mask = src_mask[None, :, :] + pad_add[:, None, :]

    def th(t):
        return t.reshape(S, N, H, Dh).transpose(1, 2, 0, 3)

    for lyr in params["layers"]:
        qkv = lin(x, lyr["w_in"], lyr["b_in"])
        q, k, vv = (th(t) for t in jnp.split(qkv, 3, axis=1))
        s = jnp.einsum("nhqd,nhkd->nhqk", q, k, precision=HIGH) / math.sqrt(Dh)
        s = s + mask[:, None, :, :]
        s = s - jnp.max(s, -1, keepdims=True)
        pz = jnp.exp(s)
        pz = pz / jnp.sum(pz, -1, keepdims=True)
        a = jnp.einsum("nhqk,nhkd->nhqd", pz, vv, precision=HIGH)
        a = a.transpose(2, 0, 1, 3).reshape(S * N, D)
        a = lin(a, lyr["w_out"], lyr["b_out"])
        x = ln(x + a, lyr["g1"], lyr["be1"])
        f = jnp.maximum(lin(x, lyr["w1"], lyr["b1"]), 0.0)
        f = lin(f, lyr["w2"], lyr["b2"])
        x = ln(x + f, lyr["g2"], lyr["be2"])

    out = jax.nn.sigmoid(lin(x, params["Wo"], params["bo"]))
    return out.reshape(S, N, F)


if __name__ == "__main__":
    # small shapes consistent with the module's forward signature
    N_FEATURES, N_CLASSES = 9, 4
    D_MODEL, N_HEADS, N_HIDDEN, N_LAYERS = 64, 4, 64, 2
    T, N = 7, 2        # src: (T, N, n_features), sequence-first like PyTorch
    S = T + 1          # prompt token is prepended

    key = jax.random.PRNGKey(0)
    k_params, k_src, k_prompt = jax.random.split(key, 3)

    params = init_params(k_params, N_FEATURES, N_CLASSES, D_MODEL, N_HEADS,
                         N_HIDDEN, N_LAYERS)
    src = jax.random.normal(k_src, (T, N, N_FEATURES), jnp.float32)
    prompt = jax.random.normal(k_prompt, (N, N_CLASSES), jnp.float32)
    src_mask = generate_square_subsequent_mask(S)
    padding_mask = jnp.zeros((N, S), bool).at[1, S - 1].set(True)

    fwd = jax.jit(partial(forward, n_heads=N_HEADS))
    out = fwd(params, src, prompt, src_mask, padding_mask)
    out = jax.block_until_ready(out)

    ref = ref_forward(params, src, prompt, src_mask, padding_mask, N_HEADS)

    assert out.shape == (S, N, N_FEATURES)
    assert bool(jnp.all(jnp.isfinite(out)))
    assert bool(jnp.allclose(out, ref, rtol=2e-2, atol=2e-2))
    print("KERNEL_OK")
</pallas_src>

<mosaic_0001>
module attributes {stable_mosaic.version = 11 : i64} {
  func.func @_embed_kernel(%arg0: i32, %arg1: memref<2x4xf32, #tpu.memory_space<vmem>>, %arg2: memref<4x64xf32, #tpu.memory_space<vmem>>, %arg3: memref<1x64xf32, #tpu.memory_space<vmem>>, %arg4: memref<14x9xf32, #tpu.memory_space<vmem>>, %arg5: memref<9x64xf32, #tpu.memory_space<vmem>>, %arg6: memref<1x64xf32, #tpu.memory_space<vmem>>, %arg7: memref<2x64xf32, #tpu.memory_space<vmem>>, %arg8: memref<14x64xf32, #tpu.memory_space<vmem>>) attributes {dimension_semantics = [#tpu.dimension_semantics<arbitrary>], iteration_bounds = array<i64: 1>, scalar_prefetch = 0 : i64, scratch_operands = 0 : i64, tpu.core_type = #tpu.core_type<tc>, window_params = [{pipeline_mode = #tpu.pipeline_mode<synchronous>, transform_indices = @transform_0, window_bounds = array<i64: 2, 4>}, {pipeline_mode = #tpu.pipeline_mode<synchronous>, transform_indices = @transform_1, window_bounds = array<i64: 4, 64>}, {pipeline_mode = #tpu.pipeline_mode<synchronous>, transform_indices = @transform_2, window_bounds = array<i64: 1, 64>}, {pipeline_mode = #tpu.pipeline_mode<synchronous>, transform_indices = @transform_3, window_bounds = array<i64: 14, 9>}, {pipeline_mode = #tpu.pipeline_mode<synchronous>, transform_indices = @transform_4, window_bounds = array<i64: 9, 64>}, {pipeline_mode = #tpu.pipeline_mode<synchronous>, transform_indices = @transform_5, window_bounds = array<i64: 1, 64>}, {pipeline_mode = #tpu.pipeline_mode<synchronous>, transform_indices = @transform_6, window_bounds = array<i64: 2, 64>}, {pipeline_mode = #tpu.pipeline_mode<synchronous>, transform_indices = @transform_7, window_bounds = array<i64: 14, 64>}]} {
    %c0 = arith.constant 0 : index
    %c0_0 = arith.constant 0 : index
    %0 = vector.load %arg1[%c0, %c0_0] : memref<2x4xf32, #tpu.memory_space<vmem>>, vector<2x4xf32>
    %c0_1 = arith.constant 0 : index
    %c0_2 = arith.constant 0 : index
    %1 = vector.load %arg2[%c0_1, %c0_2] : memref<4x64xf32, #tpu.memory_space<vmem>>, vector<4x64xf32>
    %2 = arith.truncf %0 : vector<2x4xf32> to vector<2x4xbf16>
    %3 = arith.truncf %1 : vector<4x64xf32> to vector<4x64xbf16>
    %cst = arith.constant dense<0.000000e+00> : vector<2x64xf32>
    %4 = tpu.matmul %2, %3, %cst {dimension_numbers = #tpu.dot_dimension_numbers<[1], [0], [0], [1], [0, 0, 1, 1], [], []>} : vector<2x4xbf16>, vector<4x64xbf16>, vector<2x64xf32> -> vector<2x64xf32>
    %c0_3 = arith.constant 0 : index
    %c0_4 = arith.constant 0 : index
    %5 = vector.load %arg3[%c0_3, %c0_4] : memref<1x64xf32, #tpu.memory_space<vmem>>, vector<1x64xf32>
    %6 = vector.broadcast %5 : vector<1x64xf32> to vector<2x64xf32>
    %7 = arith.addf %4, %6 : vector<2x64xf32>
    %c0_5 = arith.constant 0 : index
    %c0_6 = arith.constant 0 : index
    %8 = vector.load %arg7[%c0_5, %c0_6] : memref<2x64xf32, #tpu.memory_space<vmem>>, vector<2x64xf32>
    tpu.vector_store %arg7[%c0_5, %c0_6], %7 {strides = array<i32>} : memref<2x64xf32, #tpu.memory_space<vmem>>, vector<2x64xf32>,
    %c0_7 = arith.constant 0 : index
    %c0_8 = arith.constant 0 : index
    %9 = vector.load %arg4[%c0_7, %c0_8] : memref<14x9xf32, #tpu.memory_space<vmem>>, vector<14x9xf32>
    %c0_9 = arith.constant 0 : index
    %c0_10 = arith.constant 0 : index
    %10 = vector.load %arg5[%c0_9, %c0_10] : memref<9x64xf32, #tpu.memory_space<vmem>>, vector<9x64xf32>
    %11 = arith.truncf %9 : vector<14x9xf32> to vector<14x9xbf16>
    %12 = arith.truncf %10 : vector<9x64xf32> to vector<9x64xbf16>
    %cst_11 = arith.constant dense<0.000000e+00> : vector<14x64xf32>
    %13 = tpu.matmul %11, %12, %cst_11 {dimension_numbers = #tpu.dot_dimension_numbers<[1], [0], [0], [1], [0, 0, 1, 1], [], []>} : vector<14x9xbf16>, vector<9x64xbf16>, vector<14x64xf32> -> vector<14x64xf32>
    %c0_12 = arith.constant 0 : index
    %c0_13 = arith.constant 0 : index
    %14 = vector.load %arg6[%c0_12, %c0_13] : memref<1x64xf32, #tpu.memory_space<vmem>>, vector<1x64xf32>
    %15 = vector.broadcast %14 : vector<1x64xf32> to vector<14x64xf32>
    %16 = arith.addf %13, %15 : vector<14x64xf32>
    %c0_14 = arith.constant 0 : index
    %c0_15 = arith.constant 0 : index
    %17 = vector.load %arg8[%c0_14, %c0_15] : memref<14x64xf32, #tpu.memory_space<vmem>>, vector<14x64xf32>
    tpu.vector_store %arg8[%c0_14, %c0_15], %16 {strides = array<i32>} : memref<14x64xf32, #tpu.memory_space<vmem>>, vector<14x64xf32>,
    return
  }
  func.func @transform_0(%arg0: i32) -> (i32, i32) {
    %c0_i32 = arith.constant 0 : i32
    %c0_i32_0 = arith.constant 0 : i32
    %c0_i32_1 = arith.constant 0 : i32
    return %c0_i32, %c0_i32_0 : i32, i32
  }
  func.func @transform_1(%arg0: i32) -> (i32, i32) {
    %c0_i32 = arith.constant 0 : i32
    %c0_i32_0 = arith.constant 0 : i32
    %c0_i32_1 = arith.constant 0 : i32
    return %c0_i32, %c0_i32_0 : i32, i32
  }
  func.func @transform_2(%arg0: i32) -> (i32, i32) {
    %c0_i32 = arith.constant 0 : i32
    %c0_i32_0 = arith.constant 0 : i32
    %c0_i32_1 = arith.constant 0 : i32
    return %c0_i32, %c0_i32_0 : i32, i32
  }
  func.func @transform_3(%arg0: i32) -> (i32, i32) {
    %c0_i32 = arith.constant 0 : i32
    %c0_i32_0 = arith.constant 0 : i32
    %c0_i32_1 = arith.constant 0 : i32
    return %c0_i32, %c0_i32_0 : i32, i32
  }
  func.func @transform_4(%arg0: i32) -> (i32, i32) {
    %c0_i32 = arith.constant 0 : i32
    %c0_i32_0 = arith.constant 0 : i32
    %c0_i32_1 = arith.constant 0 : i32
    return %c0_i32, %c0_i32_0 : i32, i32
  }
  func.func @transform_5(%arg0: i32) -> (i32, i32) {
    %c0_i32 = arith.constant 0 : i32
    %c0_i32_0 = arith.constant 0 : i32
    %c0_i32_1 = arith.constant 0 : i32
    return %c0_i32, %c0_i32_0 : i32, i32
  }
  func.func @transform_6(%arg0: i32) -> (i32, i32) {
    %c0_i32 = arith.constant 0 : i32
    %c0_i32_0 = arith.constant 0 : i32
    %c0_i32_1 = arith.constant 0 : i32
    return %c0_i32, %c0_i32_0 : i32, i32
  }
  func.func @transform_7(%arg0: i32) -> (i32, i32) {
    %c0_i32 = arith.constant 0 : i32
    %c0_i32_0 = arith.constant 0 : i32
    %c0_i32_1 = arith.constant 0 : i32
    return %c0_i32, %c0_i32_0 : i32, i32
  }
}

module attributes {stable_mosaic.version = 11 : i64} {
  func.func @_encoder_layer_kernel(%arg0: i32, %arg1: memref<1x8x64xf32, #tpu.memory_space<vmem>>, %arg2: memref<1x8x8xf32, #tpu.memory_space<vmem>>, %arg3: memref<64x192xf32, #tpu.memory_space<vmem>>, %arg4: memref<1x192xf32, #tpu.memory_space<vmem>>, %arg5: memref<64x64xf32, #tpu.memory_space<vmem>>, %arg6: memref<1x64xf32, #tpu.memory_space<vmem>>, %arg7: memref<64x64xf32, #tpu.memory_space<vmem>>, %arg8: memref<1x64xf32, #tpu.memory_space<vmem>>, %arg9: memref<64x64xf32, #tpu.memory_space<vmem>>, %arg10: memref<1x64xf32, #tpu.memory_space<vmem>>, %arg11: memref<1x64xf32, #tpu.memory_space<vmem>>, %arg12: memref<1x64xf32, #tpu.memory_space<vmem>>, %arg13: memref<1x64xf32, #tpu.memory_space<vmem>>, %arg14: memref<1x64xf32, #tpu.memory_space<vmem>>, %arg15: memref<1x8x64xf32, #tpu.memory_space<vmem>>) attributes {dimension_semantics = [#tpu.dimension_semantics<parallel>], iteration_bounds = array<i64: 2>, scalar_prefetch = 0 : i64, scratch_operands = 0 : i64, tpu.core_type = #tpu.core_type<tc>, window_params = [{transform_indices = @transform_0, window_bounds = array<i64: 1, 8, 64>}, {transform_indices = @transform_1, window_bounds = array<i64: 1, 8, 8>}, {pipeline_mode = #tpu.pipeline_mode<synchronous>, transform_indices = @transform_2, window_bounds = array<i64: 64, 192>}, {pipeline_mode = #tpu.pipeline_mode<synchronous>, transform_indices = @transform_3, window_bounds = array<i64: 1, 192>}, {pipeline_mode = #tpu.pipeline_mode<synchronous>, transform_indices = @transform_4, window_bounds = array<i64: 64, 64>}, {pipeline_mode = #tpu.pipeline_mode<synchronous>, transform_indices = @transform_5, window_bounds = array<i64: 1, 64>}, {pipeline_mode = #tpu.pipeline_mode<synchronous>, transform_indices = @transform_6, window_bounds = array<i64: 64, 64>}, {pipeline_mode = #tpu.pipeline_mode<synchronous>, transform_indices = @transform_7, window_bounds = array<i64: 1, 64>}, {pipeline_mode = #tpu.pipeline_mode<synchronous>, transform_indices = @transform_8, window_bounds = array<i64: 64, 64>}, {pipeline_mode = #tpu.pipeline_mode<synchronous>, transform_indices = @transform_9, window_bounds = array<i64: 1, 64>}, {pipeline_mode = #tpu.pipeline_mode<synchronous>, transform_indices = @transform_10, window_bounds = array<i64: 1, 64>}, {pipeline_mode = #tpu.pipeline_mode<synchronous>, transform_indices = @transform_11, window_bounds = array<i64: 1, 64>}, {pipeline_mode = #tpu.pipeline_mode<synchronous>, transform_indices = @transform_12, window_bounds = array<i64: 1, 64>}, {pipeline_mode = #tpu.pipeline_mode<synchronous>, transform_indices = @transform_13, window_bounds = array<i64: 1, 64>}, {transform_indices = @transform_14, window_bounds = array<i64: 1, 8, 64>}]} {
    %c0 = arith.constant 0 : index
    %c0_0 = arith.constant 0 : index
    %c0_1 = arith.constant 0 : index
    %0 = vector.load %arg1[%c0, %c0_0, %c0_1] : memref<1x8x64xf32, #tpu.memory_space<vmem>>, vector<1x8x64xf32>
    %1 = vector.shape_cast %0 : vector<1x8x64xf32> to vector<8x64xf32>
    %c0_2 = arith.constant 0 : index
    %c0_3 = arith.constant 0 : index
    %c0_4 = arith.constant 0 : index
    %2 = vector.load %arg2[%c0_2, %c0_3, %c0_4] : memref<1x8x8xf32, #tpu.memory_space<vmem>>, vector<1x8x8xf32>
    %3 = vector.shape_cast %2 : vector<1x8x8xf32> to vector<8x8xf32>
    %c0_5 = arith.constant 0 : index
    %c0_6 = arith.constant 0 : index
    %4 = vector.load %arg3[%c0_5, %c0_6] : memref<64x192xf32, #tpu.memory_space<vmem>>, vector<64x192xf32>
    %5 = arith.truncf %1 : vector<8x64xf32> to vector<8x64xbf16>
    %6 = arith.truncf %4 : vector<64x192xf32> to vector<64x192xbf16>
    %cst = arith.constant dense<0.000000e+00> : vector<8x192xf32>
    %7 = tpu.matmul %5, %6, %cst {dimension_numbers = #tpu.dot_dimension_numbers<[1], [0], [0], [1], [0, 0, 1, 1], [], []>} : vector<8x64xbf16>, vector<64x192xbf16>, vector<8x192xf32> -> vector<8x192xf32>
    %c0_7 = arith.constant 0 : index
    %c0_8 = arith.constant 0 : index
    %8 = vector.load %arg4[%c0_7, %c0_8] : memref<1x192xf32, #tpu.memory_space<vmem>>, vector<1x192xf32>
    %9 = vector.broadcast %8 : vector<1x192xf32> to vector<8x192xf32>
    %10 = arith.addf %7, %9 : vector<8x192xf32>
    %c0_9 = arith.constant 0 : index
    %c0_10 = arith.constant 0 : index
    %11 = vector.load %arg5[%c0_9, %c0_10] : memref<64x64xf32, #tpu.memory_space<vmem>>, vector<64x64xf32>
    %cst_11 = arith.constant 0.000000e+00 : f32
    %12 = vector.broadcast %cst_11 : f32 to vector<8x64xf32>
    %13 = vector.extract_strided_slice %10 {offsets = [0, 0], sizes = [8, 16], strides = [1, 1]} : vector<8x192xf32> to vector<8x16xf32>
    %14 = vector.extract_strided_slice %10 {offsets = [0, 64], sizes = [8, 16], strides = [1, 1]} : vector<8x192xf32> to vector<8x16xf32>
    %15 = vector.extract_strided_slice %10 {offsets = [0, 128], sizes = [8, 16], strides = [1, 1]} : vector<8x192xf32> to vector<8x16xf32>
    %16 = arith.truncf %13 : vector<8x16xf32> to vector<8x16xbf16>
    %17 = arith.truncf %14 : vector<8x16xf32> to vector<8x16xbf16>
    %cst_12 = arith.constant dense<0.000000e+00> : vector<8x8xf32>
    %18 = tpu.matmul %16, %17, %cst_12 {dimension_numbers = #tpu.dot_dimension_numbers<[1], [1], [0], [0], [0, 0, 1, 0], [], []>} : vector<8x16xbf16>, vector<8x16xbf16>, vector<8x8xf32> -> vector<8x8xf32>
    %cst_13 = arith.constant 2.500000e-01 : f32
    %19 = vector.broadcast %cst_13 : f32 to vector<8x8xf32>
    %20 = arith.mulf %18, %19 : vector<8x8xf32>
    %21 = arith.addf %20, %3 : vector<8x8xf32>
    %cst_14 = arith.constant dense<0xFF800000> : vector<8xf32>
    %22 = vector.multi_reduction <maximumf>, %21, %cst_14 [1] : vector<8x8xf32> to vector<8xf32>
    %23 = vector.shape_cast %22 : vector<8xf32> to vector<8x1xf32>
    %24 = vector.broadcast %23 : vector<8x1xf32> to vector<8x8xf32>
    %25 = arith.subf %21, %24 : vector<8x8xf32>
    %26 = math.exp %25 : vector<8x8xf32>
    %cst_15 = arith.constant dense<0.000000e+00> : vector<8xf32>
    %27 = vector.multi_reduction <add>, %26, %cst_15 [1] : vector<8x8xf32> to vector<8xf32>
    %28 = vector.shape_cast %27 : vector<8xf32> to vector<8x1xf32>
    %29 = tpu.reciprocal %28 {approx = true} : vector<8x1xf32> -> vector<8x1xf32>
    %30 = vector.broadcast %29 : vector<8x1xf32> to vector<8x8xf32>
    %31 = arith.mulf %26, %30 : vector<8x8xf32>
    %32 = arith.truncf %31 : vector<8x8xf32> to vector<8x8xbf16>
    %33 = arith.truncf %15 : vector<8x16xf32> to vector<8x16xbf16>
    %cst_16 = arith.constant dense<0.000000e+00> : vector<8x16xf32>
    %34 = tpu.matmul %32, %33, %cst_16 {dimension_numbers = #tpu.dot_dimension_numbers<[1], [0], [0], [1], [0, 0, 1, 1], [], []>} : vector<8x8xbf16>, vector<8x16xbf16>, vector<8x16xf32> -> vector<8x16xf32>
    %35 = vector.extract_strided_slice %11 {offsets = [0, 0], sizes = [16, 64], strides = [1, 1]} : vector<64x64xf32> to vector<16x64xf32>
    %36 = arith.truncf %34 : vector<8x16xf32> to vector<8x16xbf16>
    %37 = arith.truncf %35 : vector<16x64xf32> to vector<16x64xbf16>
    %cst_17 = arith.constant dense<0.000000e+00> : vector<8x64xf32>
    %38 = tpu.matmul %36, %37, %cst_17 {dimension_numbers = #tpu.dot_dimension_numbers<[1], [0], [0], [1], [0, 0, 1, 1], [], []>} : vector<8x16xbf16>, vector<16x64xbf16>, vector<8x64xf32> -> vector<8x64xf32>
    %39 = arith.addf %12, %38 : vector<8x64xf32>
    %40 = vector.extract_strided_slice %10 {offsets = [0, 16], sizes = [8, 16], strides = [1, 1]} : vector<8x192xf32> to vector<8x16xf32>
    %41 = vector.extract_strided_slice %10 {offsets = [0, 80], sizes = [8, 16], strides = [1, 1]} : vector<8x192xf32> to vector<8x16xf32>
    %42 = vector.extract_strided_slice %10 {offsets = [0, 144], sizes = [8, 16], strides = [1, 1]} : vector<8x192xf32> to vector<8x16xf32>
    %43 = arith.truncf %40 : vector<8x16xf32> to vector<8x16xbf16>
    %44 = arith.truncf %41 : vector<8x16xf32> to vector<8x16xbf16>
    %cst_18 = arith.constant dense<0.000000e+00> : vector<8x8xf32>
    %45 = tpu.matmul %43, %44, %cst_18 {dimension_numbers = #tpu.dot_dimension_numbers<[1], [1], [0], [0], [0, 0, 1, 0], [], []>} : vector<8x16xbf16>, vector<8x16xbf16>, vector<8x8xf32> -> vector<8x8xf32>
    %cst_19 = arith.constant 2.500000e-01 : f32
    %46 = vector.broadcast %cst_19 : f32 to vector<8x8xf32>
    %47 = arith.mulf %45, %46 : vector<8x8xf32>
    %48 = arith.addf %47, %3 : vector<8x8xf32>
    %cst_20 = arith.constant dense<0xFF800000> : vector<8xf32>
    %49 = vector.multi_reduction <maximumf>, %48, %cst_20 [1] : vector<8x8xf32> to vector<8xf32>
    %50 = vector.shape_cast %49 : vector<8xf32> to vector<8x1xf32>
    %51 = vector.broadcast %50 : vector<8x1xf32> to vector<8x8xf32>
    %52 = arith.subf %48, %51 : vector<8x8xf32>
    %53 = math.exp %52 : vector<8x8xf32>
    %cst_21 = arith.constant dense<0.000000e+00> : vector<8xf32>
    %54 = vector.multi_reduction <add>, %53, %cst_21 [1] : vector<8x8xf32> to vector<8xf32>
    %55 = vector.shape_cast %54 : vector<8xf32> to vector<8x1xf32>
    %56 = tpu.reciprocal %55 {approx = true} : vector<8x1xf32> -> vector<8x1xf32>
    %57 = vector.broadcast %56 : vector<8x1xf32> to vector<8x8xf32>
    %58 = arith.mulf %53, %57 : vector<8x8xf32>
    %59 = arith.truncf %58 : vector<8x8xf32> to vector<8x8xbf16>
    %60 = arith.truncf %42 : vector<8x16xf32> to vector<8x16xbf16>
    %cst_22 = arith.constant dense<0.000000e+00> : vector<8x16xf32>
    %61 = tpu.matmul %59, %60, %cst_22 {dimension_numbers = #tpu.dot_dimension_numbers<[1], [0], [0], [1], [0, 0, 1, 1], [], []>} : vector<8x8xbf16>, vector<8x16xbf16>, vector<8x16xf32> -> vector<8x16xf32>
    %62 = vector.extract_strided_slice %11 {offsets = [16, 0], sizes = [16, 64], strides = [1, 1]} : vector<64x64xf32> to vector<16x64xf32>
    %63 = arith.truncf %61 : vector<8x16xf32> to vector<8x16xbf16>
    %64 = arith.truncf %62 : vector<16x64xf32> to vector<16x64xbf16>
    %cst_23 = arith.constant dense<0.000000e+00> : vector<8x64xf32>
    %65 = tpu.matmul %63, %64, %cst_23 {dimension_numbers = #tpu.dot_dimension_numbers<[1], [0], [0], [1], [0, 0, 1, 1], [], []>} : vector<8x16xbf16>, vector<16x64xbf16>, vector<8x64xf32> -> vector<8x64xf32>
    %66 = arith.addf %39, %65 : vector<8x64xf32>
    %67 = vector.extract_strided_slice %10 {offsets = [0, 32], sizes = [8, 16], strides = [1, 1]} : vector<8x192xf32> to vector<8x16xf32>
    %68 = vector.extract_strided_slice %10 {offsets = [0, 96], sizes = [8, 16], strides = [1, 1]} : vector<8x192xf32> to vector<8x16xf32>
    %69 = vector.extract_strided_slice %10 {offsets = [0, 160], sizes = [8, 16], strides = [1, 1]} : vector<8x192xf32> to vector<8x16xf32>
    %70 = arith.truncf %67 : vector<8x16xf32> to vector<8x16xbf16>
    %71 = arith.truncf %68 : vector<8x16xf32> to vector<8x16xbf16>
    %cst_24 = arith.constant dense<0.000000e+00> : vector<8x8xf32>
    %72 = tpu.matmul %70, %71, %cst_24 {dimension_numbers = #tpu.dot_dimension_numbers<[1], [1], [0], [0], [0, 0, 1, 0], [], []>} : vector<8x16xbf16>, vector<8x16xbf16>, vector<8x8xf32> -> vector<8x8xf32>
    %cst_25 = arith.constant 2.500000e-01 : f32
    %73 = vector.broadcast %cst_25 : f32 to vector<8x8xf32>
    %74 = arith.mulf %72, %73 : vector<8x8xf32>
    %75 = arith.addf %74, %3 : vector<8x8xf32>
    %cst_26 = arith.constant dense<0xFF800000> : vector<8xf32>
    %76 = vector.multi_reduction <maximumf>, %75, %cst_26 [1] : vector<8x8xf32> to vector<8xf32>
    %77 = vector.shape_cast %76 : vector<8xf32> to vector<8x1xf32>
    %78 = vector.broadcast %77 : vector<8x1xf32> to vector<8x8xf32>
    %79 = arith.subf %75, %78 : vector<8x8xf32>
    %80 = math.exp %79 : vector<8x8xf32>
    %cst_27 = arith.constant dense<0.000000e+00> : vector<8xf32>
    %81 = vector.multi_reduction <add>, %80, %cst_27 [1] : vector<8x8xf32> to vector<8xf32>
    %82 = vector.shape_cast %81 : vector<8xf32> to vector<8x1xf32>
    %83 = tpu.reciprocal %82 {approx = true} : vector<8x1xf32> -> vector<8x1xf32>
    %84 = vector.broadcast %83 : vector<8x1xf32> to vector<8x8xf32>
    %85 = arith.mulf %80, %84 : vector<8x8xf32>
    %86 = arith.truncf %85 : vector<8x8xf32> to vector<8x8xbf16>
    %87 = arith.truncf %69 : vector<8x16xf32> to vector<8x16xbf16>
    %cst_28 = arith.constant dense<0.000000e+00> : vector<8x16xf32>
    %88 = tpu.matmul %86, %87, %cst_28 {dimension_numbers = #tpu.dot_dimension_numbers<[1], [0], [0], [1], [0, 0, 1, 1], [], []>} : vector<8x8xbf16>, vector<8x16xbf16>, vector<8x16xf32> -> vector<8x16xf32>
    %89 = vector.extract_strided_slice %11 {offsets = [32, 0], sizes = [16, 64], strides = [1, 1]} : vector<64x64xf32> to vector<16x64xf32>
    %90 = arith.truncf %88 : vector<8x16xf32> to vector<8x16xbf16>
    %91 = arith.truncf %89 : vector<16x64xf32> to vector<16x64xbf16>
    %cst_29 = arith.constant dense<0.000000e+00> : vector<8x64xf32>
    %92 = tpu.matmul %90, %91, %cst_29 {dimension_numbers = #tpu.dot_dimension_numbers<[1], [0], [0], [1], [0, 0, 1, 1], [], []>} : vector<8x16xbf16>, vector<16x64xbf16>, vector<8x64xf32> -> vector<8x64xf32>
    %93 = arith.addf %66, %92 : vector<8x64xf32>
    %94 = vector.extract_strided_slice %10 {offsets = [0, 48], sizes = [8, 16], strides = [1, 1]} : vector<8x192xf32> to vector<8x16xf32>
    %95 = vector.extract_strided_slice %10 {offsets = [0, 112], sizes = [8, 16], strides = [1, 1]} : vector<8x192xf32> to vector<8x16xf32>
    %96 = vector.extract_strided_slice %10 {offsets = [0, 176], sizes = [8, 16], strides = [1, 1]} : vector<8x192xf32> to vector<8x16xf32>
    %97 = arith.truncf %94 : vector<8x16xf32> to vector<8x16xbf16>
    %98 = arith.truncf %95 : vector<8x16xf32> to vector<8x16xbf16>
    %cst_30 = arith.constant dense<0.000000e+00> : vector<8x8xf32>
    %99 = tpu.matmul %97, %98, %cst_30 {dimension_numbers = #tpu.dot_dimension_numbers<[1], [1], [0], [0], [0, 0, 1, 0], [], []>} : vector<8x16xbf16>, vector<8x16xbf16>, vector<8x8xf32> -> vector<8x8xf32>
    %cst_31 = arith.constant 2.500000e-01 : f32
    %100 = vector.broadcast %cst_31 : f32 to vector<8x8xf32>
    %101 = arith.mulf %99, %100 : vector<8x8xf32>
    %102 = arith.addf %101, %3 : vector<8x8xf32>
    %cst_32 = arith.constant dense<0xFF800000> : vector<8xf32>
    %103 = vector.multi_reduction <maximumf>, %102, %cst_32 [1] : vector<8x8xf32> to vector<8xf32>
    %104 = vector.shape_cast %103 : vector<8xf32> to vector<8x1xf32>
    %105 = vector.broadcast %104 : vector<8x1xf32> to vector<8x8xf32>
    %106 = arith.subf %102, %105 : vector<8x8xf32>
    %107 = math.exp %106 : vector<8x8xf32>
    %cst_33 = arith.constant dense<0.000000e+00> : vector<8xf32>
    %108 = vector.multi_reduction <add>, %107, %cst_33 [1] : vector<8x8xf32> to vector<8xf32>
    %109 = vector.shape_cast %108 : vector<8xf32> to vector<8x1xf32>
    %110 = tpu.reciprocal %109 {approx = true} : vector<8x1xf32> -> vector<8x1xf32>
    %111 = vector.broadcast %110 : vector<8x1xf32> to vector<8x8xf32>
    %112 = arith.mulf %107, %111 : vector<8x8xf32>
    %113 = arith.truncf %112 : vector<8x8xf32> to vector<8x8xbf16>
    %114 = arith.truncf %96 : vector<8x16xf32> to vector<8x16xbf16>
    %cst_34 = arith.constant dense<0.000000e+00> : vector<8x16xf32>
    %115 = tpu.matmul %113, %114, %cst_34 {dimension_numbers = #tpu.dot_dimension_numbers<[1], [0], [0], [1], [0, 0, 1, 1], [], []>} : vector<8x8xbf16>, vector<8x16xbf16>, vector<8x16xf32> -> vector<8x16xf32>
    %116 = vector.extract_strided_slice %11 {offsets = [48, 0], sizes = [16, 64], strides = [1, 1]} : vector<64x64xf32> to vector<16x64xf32>
    %117 = arith.truncf %115 : vector<8x16xf32> to vector<8x16xbf16>
    %118 = arith.truncf %116 : vector<16x64xf32> to vector<16x64xbf16>
    %cst_35 = arith.constant dense<0.000000e+00> : vector<8x64xf32>
    %119 = tpu.matmul %117, %118, %cst_35 {dimension_numbers = #tpu.dot_dimension_numbers<[1], [0], [0], [1], [0, 0, 1, 1], [], []>} : vector<8x16xbf16>, vector<16x64xbf16>, vector<8x64xf32> -> vector<8x64xf32>
    %120 = arith.addf %93, %119 : vector<8x64xf32>
    %c0_36 = arith.constant 0 : index
    %c0_37 = arith.constant 0 : index
    %121 = vector.load %arg6[%c0_36, %c0_37] : memref<1x64xf32, #tpu.memory_space<vmem>>, vector<1x64xf32>
    %122 = vector.broadcast %121 : vector<1x64xf32> to vector<8x64xf32>
    %123 = arith.addf %120, %122 : vector<8x64xf32>
    %124 = arith.addf %1, %123 : vector<8x64xf32>
    %c0_38 = arith.constant 0 : index
    %c0_39 = arith.constant 0 : index
    %125 = vector.load %arg11[%c0_38, %c0_39] : memref<1x64xf32, #tpu.memory_space<vmem>>, vector<1x64xf32>
    %c0_40 = arith.constant 0 : index
    %c0_41 = arith.constant 0 : index
    %126 = vector.load %arg12[%c0_40, %c0_41] : memref<1x64xf32, #tpu.memory_space<vmem>>, vector<1x64xf32>
    %cst_42 = arith.constant dense<0.000000e+00> : vector<8xf32>
    %127 = vector.multi_reduction <add>, %124, %cst_42 [1] : vector<8x64xf32> to vector<8xf32>
    %128 = vector.shape_cast %127 : vector<8xf32> to vector<8x1xf32>
    %cst_43 = arith.constant 6.400000e+01 : f32
    %129 = vector.broadcast %cst_43 : f32 to vector<8x1xf32>
    %130 = arith.divf %128, %129 : vector<8x1xf32>
    %131 = vector.broadcast %130 : vector<8x1xf32> to vector<8x64xf32>
    %132 = arith.subf %124, %131 : vector<8x64xf32>
    %133 = arith.mulf %132, %132 : vector<8x64xf32>
    %cst_44 = arith.constant dense<0.000000e+00> : vector<8xf32>
    %134 = vector.multi_reduction <add>, %133, %cst_44 [1] : vector<8x64xf32> to vector<8xf32>
    %135 = vector.shape_cast %134 : vector<8xf32> to vector<8x1xf32>
    %cst_45 = arith.constant 6.400000e+01 : f32
    %136 = vector.broadcast %cst_45 : f32 to vector<8x1xf32>
    %137 = arith.divf %135, %136 : vector<8x1xf32>
    %cst_46 = arith.constant 9.99999974E-6 : f32
    %138 = vector.broadcast %cst_46 : f32 to vector<8x1xf32>
    %139 = arith.addf %137, %138 : vector<8x1xf32>
    %140 = math.rsqrt %139 : vector<8x1xf32>
    %141 = vector.broadcast %140 : vector<8x1xf32> to vector<8x64xf32>
    %142 = arith.mulf %132, %141 : vector<8x64xf32>
    %143 = vector.broadcast %125 : vector<1x64xf32> to vector<8x64xf32>
    %144 = arith.mulf %142, %143 : vector<8x64xf32>
    %145 = vector.broadcast %126 : vector<1x64xf32> to vector<8x64xf32>
    %146 = arith.addf %144, %145 : vector<8x64xf32>
    %c0_47 = arith.constant 0 : index
    %c0_48 = arith.constant 0 : index
    %147 = vector.load %arg7[%c0_47, %c0_48] : memref<64x64xf32, #tpu.memory_space<vmem>>, vector<64x64xf32>
    %148 = arith.truncf %146 : vector<8x64xf32> to vector<8x64xbf16>
    %149 = arith.truncf %147 : vector<64x64xf32> to vector<64x64xbf16>
    %cst_49 = arith.constant dense<0.000000e+00> : vector<8x64xf32>
    %150 = tpu.matmul %148, %149, %cst_49 {dimension_numbers = #tpu.dot_dimension_numbers<[1], [0], [0], [1], [0, 0, 1, 1], [], []>} : vector<8x64xbf16>, vector<64x64xbf16>, vector<8x64xf32> -> vector<8x64xf32>
    %c0_50 = arith.constant 0 : index
    %c0_51 = arith.constant 0 : index
    %151 = vector.load %arg8[%c0_50, %c0_51] : memref<1x64xf32, #tpu.memory_space<vmem>>, vector<1x64xf32>
    %152 = vector.broadcast %151 : vector<1x64xf32> to vector<8x64xf32>
    %153 = arith.addf %150, %152 : vector<8x64xf32>
    %cst_52 = arith.constant 0.000000e+00 : f32
    %154 = vector.broadcast %cst_52 : f32 to vector<8x64xf32>
    %155 = arith.maximumf %153, %154 : vector<8x64xf32>
    %c0_53 = arith.constant 0 : index
    %c0_54 = arith.constant 0 : index
    %156 = vector.load %arg9[%c0_53, %c0_54] : memref<64x64xf32, #tpu.memory_space<vmem>>, vector<64x64xf32>
    %157 = arith.truncf %155 : vector<8x64xf32> to vector<8x64xbf16>
    %158 = arith.truncf %156 : vector<64x64xf32> to vector<64x64xbf16>
    %cst_55 = arith.constant dense<0.000000e+00> : vector<8x64xf32>
    %159 = tpu.matmul %157, %158, %cst_55 {dimension_numbers = #tpu.dot_dimension_numbers<[1], [0], [0], [1], [0, 0, 1, 1], [], []>} : vector<8x64xbf16>, vector<64x64xbf16>, vector<8x64xf32> -> vector<8x64xf32>
    %c0_56 = arith.constant 0 : index
    %c0_57 = arith.constant 0 : index
    %160 = vector.load %arg10[%c0_56, %c0_57] : memref<1x64xf32, #tpu.memory_space<vmem>>, vector<1x64xf32>
    %161 = vector.broadcast %160 : vector<1x64xf32> to vector<8x64xf32>
    %162 = arith.addf %159, %161 : vector<8x64xf32>
    %163 = arith.addf %146, %162 : vector<8x64xf32>
    %c0_58 = arith.constant 0 : index
    %c0_59 = arith.constant 0 : index
    %164 = vector.load %arg13[%c0_58, %c0_59] : memref<1x64xf32, #tpu.memory_space<vmem>>, vector<1x64xf32>
    %c0_60 = arith.constant 0 : index
    %c0_61 = arith.constant 0 : index
    %165 = vector.load %arg14[%c0_60, %c0_61] : memref<1x64xf32, #tpu.memory_space<vmem>>, vector<1x64xf32>
    %cst_62 = arith.constant dense<0.000000e+00> : vector<8xf32>
    %166 = vector.multi_reduction <add>, %163, %cst_62 [1] : vector<8x64xf32> to vector<8xf32>
    %167 = vector.shape_cast %166 : vector<8xf32> to vector<8x1xf32>
    %cst_63 = arith.constant 6.400000e+01 : f32
    %168 = vector.broadcast %cst_63 : f32 to vector<8x1xf32>
    %169 = arith.divf %167, %168 : vector<8x1xf32>
    %170 = vector.broadcast %169 : vector<8x1xf32> to vector<8x64xf32>
    %171 = arith.subf %163, %170 : vector<8x64xf32>
    %172 = arith.mulf %171, %171 : vector<8x64xf32>
    %cst_64 = arith.constant dense<0.000000e+00> : vector<8xf32>
    %173 = vector.multi_reduction <add>, %172, %cst_64 [1] : vector<8x64xf32> to vector<8xf32>
    %174 = vector.shape_cast %173 : vector<8xf32> to vector<8x1xf32>
    %cst_65 = arith.constant 6.400000e+01 : f32
    %175 = vector.broadcast %cst_65 : f32 to vector<8x1xf32>
    %176 = arith.divf %174, %175 : vector<8x1xf32>
    %cst_66 = arith.constant 9.99999974E-6 : f32
    %177 = vector.broadcast %cst_66 : f32 to vector<8x1xf32>
    %178 = arith.addf %176, %177 : vector<8x1xf32>
    %179 = math.rsqrt %178 : vector<8x1xf32>
    %180 = vector.broadcast %179 : vector<8x1xf32> to vector<8x64xf32>
    %181 = arith.mulf %171, %180 : vector<8x64xf32>
    %182 = vector.broadcast %164 : vector<1x64xf32> to vector<8x64xf32>
    %183 = arith.mulf %181, %182 : vector<8x64xf32>
    %184 = vector.broadcast %165 : vector<1x64xf32> to vector<8x64xf32>
    %185 = arith.addf %183, %184 : vector<8x64xf32>
    %c0_67 = arith.constant 0 : index
    %c0_68 = arith.constant 0 : index
    %c0_69 = arith.constant 0 : index
    %186 = vector.load %arg15[%c0_67, %c0_68, %c0_69] : memref<1x8x64xf32, #tpu.memory_space<vmem>>, vector<1x8x64xf32>
    %187 = vector.shape_cast %186 : vector<1x8x64xf32> to vector<8x64xf32>
    %188 = vector.shape_cast %185 : vector<8x64xf32> to vector<1x8x64xf32>
    tpu.vector_store %arg15[%c0_67, %c0_68, %c0_69], %188 {strides = array<i32>} : memref<1x8x64xf32, #tpu.memory_space<vmem>>, vector<1x8x64xf32>,
    return
  }
  func.func @transform_0(%arg0: i32) -> (i32, i32, i32) {
    %c0_i32 = arith.constant 0 : i32
    %c0_i32_0 = arith.constant 0 : i32
    %c0_i32_1 = arith.constant 0 : i32
    return %arg0, %c0_i32, %c0_i32_0 : i32, i32, i32
  }
  func.func @transform_1(%arg0: i32) -> (i32, i32, i32) {
    %c0_i32 = arith.constant 0 : i32
    %c0_i32_0 = arith.constant 0 : i32
    %c0_i32_1 = arith.constant 0 : i32
    return %arg0, %c0_i32, %c0_i32_0 : i32, i32, i32
  }
  func.func @transform_2(%arg0: i32) -> (i32, i32) {
    %c0_i32 = arith.constant 0 : i32
    %c0_i32_0 = arith.constant 0 : i32
    %c0_i32_1 = arith.constant 0 : i32
    return %c0_i32, %c0_i32_0 : i32, i32
  }
  func.func @transform_3(%arg0: i32) -> (i32, i32) {
    %c0_i32 = arith.constant 0 : i32
    %c0_i32_0 = arith.constant 0 : i32
    %c0_i32_1 = arith.constant 0 : i32
    return %c0_i32, %c0_i32_0 : i32, i32
  }
  func.func @transform_4(%arg0: i32) -> (i32, i32) {
    %c0_i32 = arith.constant 0 : i32
    %c0_i32_0 = arith.constant 0 : i32
    %c0_i32_1 = arith.constant 0 : i32
    return %c0_i32, %c0_i32_0 : i32, i32
  }
  func.func @transform_5(%arg0: i32) -> (i32, i32) {
    %c0_i32 = arith.constant 0 : i32
    %c0_i32_0 = arith.constant 0 : i32
    %c0_i32_1 = arith.constant 0 : i32
    return %c0_i32, %c0_i32_0 : i32, i32
  }
  func.func @transform_6(%arg0: i32) -> (i32, i32) {
    %c0_i32 = arith.constant 0 : i32
    %c0_i32_0 = arith.constant 0 : i32
    %c0_i32_1 = arith.constant 0 : i32
    return %c0_i32, %c0_i32_0 : i32, i32
  }
  func.func @transform_7(%arg0: i32) -> (i32, i32) {
    %c0_i32 = arith.constant 0 : i32
    %c0_i32_0 = arith.constant 0 : i32
    %c0_i32_1 = arith.constant 0 : i32
    return %c0_i32, %c0_i32_0 : i32, i32
  }
  func.func @transform_8(%arg0: i32) -> (i32, i32) {
    %c0_i32 = arith.constant 0 : i32
    %c0_i32_0 = arith.constant 0 : i32
    %c0_i32_1 = arith.constant 0 : i32
    return %c0_i32, %c0_i32_0 : i32, i32
  }
  func.func @transform_9(%arg0: i32) -> (i32, i32) {
    %c0_i32 = arith.constant 0 : i32
    %c0_i32_0 = arith.constant 0 : i32
    %c0_i32_1 = arith.constant 0 : i32
    return %c0_i32, %c0_i32_0 : i32, i32
  }
  func.func @transform_10(%arg0: i32) -> (i32, i32) {
    %c0_i32 = arith.constant 0 : i32
    %c0_i32_0 = arith.constant 0 : i32
    %c0_i32_1 = arith.constant 0 : i32
    return %c0_i32, %c0_i32_0 : i32, i32
  }
  func.func @transform_11(%arg0: i32) -> (i32, i32) {
    %c0_i32 = arith.constant 0 : i32
    %c0_i32_0 = arith.constant 0 : i32
    %c0_i32_1 = arith.constant 0 : i32
    return %c0_i32, %c0_i32_0 : i32, i32
  }
  func.func @transform_12(%arg0: i32) -> (i32, i32) {
    %c0_i32 = arith.constant 0 : i32
    %c0_i32_0 = arith.constant 0 : i32
    %c0_i32_1 = arith.constant 0 : i32
    return %c0_i32, %c0_i32_0 : i32, i32
  }
  func.func @transform_13(%arg0: i32) -> (i32, i32) {
    %c0_i32 = arith.constant 0 : i32
    %c0_i32_0 = arith.constant 0 : i32
    %c0_i32_1 = arith.constant 0 : i32
    return %c0_i32, %c0_i32_0 : i32, i32
  }
  func.func @transform_14(%arg0: i32) -> (i32, i32, i32) {
    %c0_i32 = arith.constant 0 : i32
    %c0_i32_0 = arith.constant 0 : i32
    %c0_i32_1 = arith.constant 0 : i32
    return %arg0, %c0_i32, %c0_i32_0 : i32, i32, i32
  }
}

module attributes {stable_mosaic.version = 11 : i64} {
  func.func @_encoder_layer_kernel(%arg0: i32, %arg1: memref<1x8x64xf32, #tpu.memory_space<vmem>>, %arg2: memref<1x8x8xf32, #tpu.memory_space<vmem>>, %arg3: memref<64x192xf32, #tpu.memory_space<vmem>>, %arg4: memref<1x192xf32, #tpu.memory_space<vmem>>, %arg5: memref<64x64xf32, #tpu.memory_space<vmem>>, %arg6: memref<1x64xf32, #tpu.memory_space<vmem>>, %arg7: memref<64x64xf32, #tpu.memory_space<vmem>>, %arg8: memref<1x64xf32, #tpu.memory_space<vmem>>, %arg9: memref<64x64xf32, #tpu.memory_space<vmem>>, %arg10: memref<1x64xf32, #tpu.memory_space<vmem>>, %arg11: memref<1x64xf32, #tpu.memory_space<vmem>>, %arg12: memref<1x64xf32, #tpu.memory_space<vmem>>, %arg13: memref<1x64xf32, #tpu.memory_space<vmem>>, %arg14: memref<1x64xf32, #tpu.memory_space<vmem>>, %arg15: memref<1x8x64xf32, #tpu.memory_space<vmem>>) attributes {dimension_semantics = [#tpu.dimension_semantics<parallel>], iteration_bounds = array<i64: 2>, scalar_prefetch = 0 : i64, scratch_operands = 0 : i64, tpu.core_type = #tpu.core_type<tc>, window_params = [{transform_indices = @transform_0, window_bounds = array<i64: 1, 8, 64>}, {transform_indices = @transform_1, window_bounds = array<i64: 1, 8, 8>}, {pipeline_mode = #tpu.pipeline_mode<synchronous>, transform_indices = @transform_2, window_bounds = array<i64: 64, 192>}, {pipeline_mode = #tpu.pipeline_mode<synchronous>, transform_indices = @transform_3, window_bounds = array<i64: 1, 192>}, {pipeline_mode = #tpu.pipeline_mode<synchronous>, transform_indices = @transform_4, window_bounds = array<i64: 64, 64>}, {pipeline_mode = #tpu.pipeline_mode<synchronous>, transform_indices = @transform_5, window_bounds = array<i64: 1, 64>}, {pipeline_mode = #tpu.pipeline_mode<synchronous>, transform_indices = @transform_6, window_bounds = array<i64: 64, 64>}, {pipeline_mode = #tpu.pipeline_mode<synchronous>, transform_indices = @transform_7, window_bounds = array<i64: 1, 64>}, {pipeline_mode = #tpu.pipeline_mode<synchronous>, transform_indices = @transform_8, window_bounds = array<i64: 64, 64>}, {pipeline_mode = #tpu.pipeline_mode<synchronous>, transform_indices = @transform_9, window_bounds = array<i64: 1, 64>}, {pipeline_mode = #tpu.pipeline_mode<synchronous>, transform_indices = @transform_10, window_bounds = array<i64: 1, 64>}, {pipeline_mode = #tpu.pipeline_mode<synchronous>, transform_indices = @transform_11, window_bounds = array<i64: 1, 64>}, {pipeline_mode = #tpu.pipeline_mode<synchronous>, transform_indices = @transform_12, window_bounds = array<i64: 1, 64>}, {pipeline_mode = #tpu.pipeline_mode<synchronous>, transform_indices = @transform_13, window_bounds = array<i64: 1, 64>}, {transform_indices = @transform_14, window_bounds = array<i64: 1, 8, 64>}]} {
    %c0 = arith.constant 0 : index
    %c0_0 = arith.constant 0 : index
    %c0_1 = arith.constant 0 : index
    %0 = vector.load %arg1[%c0, %c0_0, %c0_1] : memref<1x8x64xf32, #tpu.memory_space<vmem>>, vector<1x8x64xf32>
    %1 = vector.shape_cast %0 : vector<1x8x64xf32> to vector<8x64xf32>
    %c0_2 = arith.constant 0 : index
    %c0_3 = arith.constant 0 : index
    %c0_4 = arith.constant 0 : index
    %2 = vector.load %arg2[%c0_2, %c0_3, %c0_4] : memref<1x8x8xf32, #tpu.memory_space<vmem>>, vector<1x8x8xf32>
    %3 = vector.shape_cast %2 : vector<1x8x8xf32> to vector<8x8xf32>
    %c0_5 = arith.constant 0 : index
    %c0_6 = arith.constant 0 : index
    %4 = vector.load %arg3[%c0_5, %c0_6] : memref<64x192xf32, #tpu.memory_space<vmem>>, vector<64x192xf32>
    %5 = arith.truncf %1 : vector<8x64xf32> to vector<8x64xbf16>
    %6 = arith.truncf %4 : vector<64x192xf32> to vector<64x192xbf16>
    %cst = arith.constant dense<0.000000e+00> : vector<8x192xf32>
    %7 = tpu.matmul %5, %6, %cst {dimension_numbers = #tpu.dot_dimension_numbers<[1], [0], [0], [1], [0, 0, 1, 1], [], []>} : vector<8x64xbf16>, vector<64x192xbf16>, vector<8x192xf32> -> vector<8x192xf32>
    %c0_7 = arith.constant 0 : index
    %c0_8 = arith.constant 0 : index
    %8 = vector.load %arg4[%c0_7, %c0_8] : memref<1x192xf32, #tpu.memory_space<vmem>>, vector<1x192xf32>
    %9 = vector.broadcast %8 : vector<1x192xf32> to vector<8x192xf32>
    %10 = arith.addf %7, %9 : vector<8x192xf32>
    %c0_9 = arith.constant 0 : index
    %c0_10 = arith.constant 0 : index
    %11 = vector.load %arg5[%c0_9, %c0_10] : memref<64x64xf32, #tpu.memory_space<vmem>>, vector<64x64xf32>
    %cst_11 = arith.constant 0.000000e+00 : f32
    %12 = vector.broadcast %cst_11 : f32 to vector<8x64xf32>
    %13 = vector.extract_strided_slice %10 {offsets = [0, 0], sizes = [8, 16], strides = [1, 1]} : vector<8x192xf32> to vector<8x16xf32>
    %14 = vector.extract_strided_slice %10 {offsets = [0, 64], sizes = [8, 16], strides = [1, 1]} : vector<8x192xf32> to vector<8x16xf32>
    %15 = vector.extract_strided_slice %10 {offsets = [0, 128], sizes = [8, 16], strides = [1, 1]} : vector<8x192xf32> to vector<8x16xf32>
    %16 = arith.truncf %13 : vector<8x16xf32> to vector<8x16xbf16>
    %17 = arith.truncf %14 : vector<8x16xf32> to vector<8x16xbf16>
    %cst_12 = arith.constant dense<0.000000e+00> : vector<8x8xf32>
    %18 = tpu.matmul %16, %17, %cst_12 {dimension_numbers = #tpu.dot_dimension_numbers<[1], [1], [0], [0], [0, 0, 1, 0], [], []>} : vector<8x16xbf16>, vector<8x16xbf16>, vector<8x8xf32> -> vector<8x8xf32>
    %cst_13 = arith.constant 2.500000e-01 : f32
    %19 = vector.broadcast %cst_13 : f32 to vector<8x8xf32>
    %20 = arith.mulf %18, %19 : vector<8x8xf32>
    %21 = arith.addf %20, %3 : vector<8x8xf32>
    %cst_14 = arith.constant dense<0xFF800000> : vector<8xf32>
    %22 = vector.multi_reduction <maximumf>, %21, %cst_14 [1] : vector<8x8xf32> to vector<8xf32>
    %23 = vector.shape_cast %22 : vector<8xf32> to vector<8x1xf32>
    %24 = vector.broadcast %23 : vector<8x1xf32> to vector<8x8xf32>
    %25 = arith.subf %21, %24 : vector<8x8xf32>
    %26 = math.exp %25 : vector<8x8xf32>
    %cst_15 = arith.constant dense<0.000000e+00> : vector<8xf32>
    %27 = vector.multi_reduction <add>, %26, %cst_15 [1] : vector<8x8xf32> to vector<8xf32>
    %28 = vector.shape_cast %27 : vector<8xf32> to vector<8x1xf32>
    %29 = tpu.reciprocal %28 {approx = true} : vector<8x1xf32> -> vector<8x1xf32>
    %30 = vector.broadcast %29 : vector<8x1xf32> to vector<8x8xf32>
    %31 = arith.mulf %26, %30 : vector<8x8xf32>
    %32 = arith.truncf %31 : vector<8x8xf32> to vector<8x8xbf16>
    %33 = arith.truncf %15 : vector<8x16xf32> to vector<8x16xbf16>
    %cst_16 = arith.constant dense<0.000000e+00> : vector<8x16xf32>
    %34 = tpu.matmul %32, %33, %cst_16 {dimension_numbers = #tpu.dot_dimension_numbers<[1], [0], [0], [1], [0, 0, 1, 1], [], []>} : vector<8x8xbf16>, vector<8x16xbf16>, vector<8x16xf32> -> vector<8x16xf32>
    %35 = vector.extract_strided_slice %11 {offsets = [0, 0], sizes = [16, 64], strides = [1, 1]} : vector<64x64xf32> to vector<16x64xf32>
    %36 = arith.truncf %34 : vector<8x16xf32> to vector<8x16xbf16>
    %37 = arith.truncf %35 : vector<16x64xf32> to vector<16x64xbf16>
    %cst_17 = arith.constant dense<0.000000e+00> : vector<8x64xf32>
    %38 = tpu.matmul %36, %37, %cst_17 {dimension_numbers = #tpu.dot_dimension_numbers<[1], [0], [0], [1], [0, 0, 1, 1], [], []>} : vector<8x16xbf16>, vector<16x64xbf16>, vector<8x64xf32> -> vector<8x64xf32>
    %39 = arith.addf %12, %38 : vector<8x64xf32>
    %40 = vector.extract_strided_slice %10 {offsets = [0, 16], sizes = [8, 16], strides = [1, 1]} : vector<8x192xf32> to vector<8x16xf32>
    %41 = vector.extract_strided_slice %10 {offsets = [0, 80], sizes = [8, 16], strides = [1, 1]} : vector<8x192xf32> to vector<8x16xf32>
    %42 = vector.extract_strided_slice %10 {offsets = [0, 144], sizes = [8, 16], strides = [1, 1]} : vector<8x192xf32> to vector<8x16xf32>
    %43 = arith.truncf %40 : vector<8x16xf32> to vector<8x16xbf16>
    %44 = arith.truncf %41 : vector<8x16xf32> to vector<8x16xbf16>
    %cst_18 = arith.constant dense<0.000000e+00> : vector<8x8xf32>
    %45 = tpu.matmul %43, %44, %cst_18 {dimension_numbers = #tpu.dot_dimension_numbers<[1], [1], [0], [0], [0, 0, 1, 0], [], []>} : vector<8x16xbf16>, vector<8x16xbf16>, vector<8x8xf32> -> vector<8x8xf32>
    %cst_19 = arith.constant 2.500000e-01 : f32
    %46 = vector.broadcast %cst_19 : f32 to vector<8x8xf32>
    %47 = arith.mulf %45, %46 : vector<8x8xf32>
    %48 = arith.addf %47, %3 : vector<8x8xf32>
    %cst_20 = arith.constant dense<0xFF800000> : vector<8xf32>
    %49 = vector.multi_reduction <maximumf>, %48, %cst_20 [1] : vector<8x8xf32> to vector<8xf32>
    %50 = vector.shape_cast %49 : vector<8xf32> to vector<8x1xf32>
    %51 = vector.broadcast %50 : vector<8x1xf32> to vector<8x8xf32>
    %52 = arith.subf %48, %51 : vector<8x8xf32>
    %53 = math.exp %52 : vector<8x8xf32>
    %cst_21 = arith.constant dense<0.000000e+00> : vector<8xf32>
    %54 = vector.multi_reduction <add>, %53, %cst_21 [1] : vector<8x8xf32> to vector<8xf32>
    %55 = vector.shape_cast %54 : vector<8xf32> to vector<8x1xf32>
    %56 = tpu.reciprocal %55 {approx = true} : vector<8x1xf32> -> vector<8x1xf32>
    %57 = vector.broadcast %56 : vector<8x1xf32> to vector<8x8xf32>
    %58 = arith.mulf %53, %57 : vector<8x8xf32>
    %59 = arith.truncf %58 : vector<8x8xf32> to vector<8x8xbf16>
    %60 = arith.truncf %42 : vector<8x16xf32> to vector<8x16xbf16>
    %cst_22 = arith.constant dense<0.000000e+00> : vector<8x16xf32>
    %61 = tpu.matmul %59, %60, %cst_22 {dimension_numbers = #tpu.dot_dimension_numbers<[1], [0], [0], [1], [0, 0, 1, 1], [], []>} : vector<8x8xbf16>, vector<8x16xbf16>, vector<8x16xf32> -> vector<8x16xf32>
    %62 = vector.extract_strided_slice %11 {offsets = [16, 0], sizes = [16, 64], strides = [1, 1]} : vector<64x64xf32> to vector<16x64xf32>
    %63 = arith.truncf %61 : vector<8x16xf32> to vector<8x16xbf16>
    %64 = arith.truncf %62 : vector<16x64xf32> to vector<16x64xbf16>
    %cst_23 = arith.constant dense<0.000000e+00> : vector<8x64xf32>
    %65 = tpu.matmul %63, %64, %cst_23 {dimension_numbers = #tpu.dot_dimension_numbers<[1], [0], [0], [1], [0, 0, 1, 1], [], []>} : vector<8x16xbf16>, vector<16x64xbf16>, vector<8x64xf32> -> vector<8x64xf32>
    %66 = arith.addf %39, %65 : vector<8x64xf32>
    %67 = vector.extract_strided_slice %10 {offsets = [0, 32], sizes = [8, 16], strides = [1, 1]} : vector<8x192xf32> to vector<8x16xf32>
    %68 = vector.extract_strided_slice %10 {offsets = [0, 96], sizes = [8, 16], strides = [1, 1]} : vector<8x192xf32> to vector<8x16xf32>
    %69 = vector.extract_strided_slice %10 {offsets = [0, 160], sizes = [8, 16], strides = [1, 1]} : vector<8x192xf32> to vector<8x16xf32>
    %70 = arith.truncf %67 : vector<8x16xf32> to vector<8x16xbf16>
    %71 = arith.truncf %68 : vector<8x16xf32> to vector<8x16xbf16>
    %cst_24 = arith.constant dense<0.000000e+00> : vector<8x8xf32>
    %72 = tpu.matmul %70, %71, %cst_24 {dimension_numbers = #tpu.dot_dimension_numbers<[1], [1], [0], [0], [0, 0, 1, 0], [], []>} : vector<8x16xbf16>, vector<8x16xbf16>, vector<8x8xf32> -> vector<8x8xf32>
    %cst_25 = arith.constant 2.500000e-01 : f32
    %73 = vector.broadcast %cst_25 : f32 to vector<8x8xf32>
    %74 = arith.mulf %72, %73 : vector<8x8xf32>
    %75 = arith.addf %74, %3 : vector<8x8xf32>
    %cst_26 = arith.constant dense<0xFF800000> : vector<8xf32>
    %76 = vector.multi_reduction <maximumf>, %75, %cst_26 [1] : vector<8x8xf32> to vector<8xf32>
    %77 = vector.shape_cast %76 : vector<8xf32> to vector<8x1xf32>
    %78 = vector.broadcast %77 : vector<8x1xf32> to vector<8x8xf32>
    %79 = arith.subf %75, %78 : vector<8x8xf32>
    %80 = math.exp %79 : vector<8x8xf32>
    %cst_27 = arith.constant dense<0.000000e+00> : vector<8xf32>
    %81 = vector.multi_reduction <add>, %80, %cst_27 [1] : vector<8x8xf32> to vector<8xf32>
    %82 = vector.shape_cast %81 : vector<8xf32> to vector<8x1xf32>
    %83 = tpu.reciprocal %82 {approx = true} : vector<8x1xf32> -> vector<8x1xf32>
    %84 = vector.broadcast %83 : vector<8x1xf32> to vector<8x8xf32>
    %85 = arith.mulf %80, %84 : vector<8x8xf32>
    %86 = arith.truncf %85 : vector<8x8xf32> to vector<8x8xbf16>
    %87 = arith.truncf %69 : vector<8x16xf32> to vector<8x16xbf16>
    %cst_28 = arith.constant dense<0.000000e+00> : vector<8x16xf32>
    %88 = tpu.matmul %86, %87, %cst_28 {dimension_numbers = #tpu.dot_dimension_numbers<[1], [0], [0], [1], [0, 0, 1, 1], [], []>} : vector<8x8xbf16>, vector<8x16xbf16>, vector<8x16xf32> -> vector<8x16xf32>
    %89 = vector.extract_strided_slice %11 {offsets = [32, 0], sizes = [16, 64], strides = [1, 1]} : vector<64x64xf32> to vector<16x64xf32>
    %90 = arith.truncf %88 : vector<8x16xf32> to vector<8x16xbf16>
    %91 = arith.truncf %89 : vector<16x64xf32> to vector<16x64xbf16>
    %cst_29 = arith.constant dense<0.000000e+00> : vector<8x64xf32>
    %92 = tpu.matmul %90, %91, %cst_29 {dimension_numbers = #tpu.dot_dimension_numbers<[1], [0], [0], [1], [0, 0, 1, 1], [], []>} : vector<8x16xbf16>, vector<16x64xbf16>, vector<8x64xf32> -> vector<8x64xf32>
    %93 = arith.addf %66, %92 : vector<8x64xf32>
    %94 = vector.extract_strided_slice %10 {offsets = [0, 48], sizes = [8, 16], strides = [1, 1]} : vector<8x192xf32> to vector<8x16xf32>
    %95 = vector.extract_strided_slice %10 {offsets = [0, 112], sizes = [8, 16], strides = [1, 1]} : vector<8x192xf32> to vector<8x16xf32>
    %96 = vector.extract_strided_slice %10 {offsets = [0, 176], sizes = [8, 16], strides = [1, 1]} : vector<8x192xf32> to vector<8x16xf32>
    %97 = arith.truncf %94 : vector<8x16xf32> to vector<8x16xbf16>
    %98 = arith.truncf %95 : vector<8x16xf32> to vector<8x16xbf16>
    %cst_30 = arith.constant dense<0.000000e+00> : vector<8x8xf32>
    %99 = tpu.matmul %97, %98, %cst_30 {dimension_numbers = #tpu.dot_dimension_numbers<[1], [1], [0], [0], [0, 0, 1, 0], [], []>} : vector<8x16xbf16>, vector<8x16xbf16>, vector<8x8xf32> -> vector<8x8xf32>
    %cst_31 = arith.constant 2.500000e-01 : f32
    %100 = vector.broadcast %cst_31 : f32 to vector<8x8xf32>
    %101 = arith.mulf %99, %100 : vector<8x8xf32>
    %102 = arith.addf %101, %3 : vector<8x8xf32>
    %cst_32 = arith.constant dense<0xFF800000> : vector<8xf32>
    %103 = vector.multi_reduction <maximumf>, %102, %cst_32 [1] : vector<8x8xf32> to vector<8xf32>
    %104 = vector.shape_cast %103 : vector<8xf32> to vector<8x1xf32>
    %105 = vector.broadcast %104 : vector<8x1xf32> to vector<8x8xf32>
    %106 = arith.subf %102, %105 : vector<8x8xf32>
    %107 = math.exp %106 : vector<8x8xf32>
    %cst_33 = arith.constant dense<0.000000e+00> : vector<8xf32>
    %108 = vector.multi_reduction <add>, %107, %cst_33 [1] : vector<8x8xf32> to vector<8xf32>
    %109 = vector.shape_cast %108 : vector<8xf32> to vector<8x1xf32>
    %110 = tpu.reciprocal %109 {approx = true} : vector<8x1xf32> -> vector<8x1xf32>
    %111 = vector.broadcast %110 : vector<8x1xf32> to vector<8x8xf32>
    %112 = arith.mulf %107, %111 : vector<8x8xf32>
    %113 = arith.truncf %112 : vector<8x8xf32> to vector<8x8xbf16>
    %114 = arith.truncf %96 : vector<8x16xf32> to vector<8x16xbf16>
    %cst_34 = arith.constant dense<0.000000e+00> : vector<8x16xf32>
    %115 = tpu.matmul %113, %114, %cst_34 {dimension_numbers = #tpu.dot_dimension_numbers<[1], [0], [0], [1], [0, 0, 1, 1], [], []>} : vector<8x8xbf16>, vector<8x16xbf16>, vector<8x16xf32> -> vector<8x16xf32>
    %116 = vector.extract_strided_slice %11 {offsets = [48, 0], sizes = [16, 64], strides = [1, 1]} : vector<64x64xf32> to vector<16x64xf32>
    %117 = arith.truncf %115 : vector<8x16xf32> to vector<8x16xbf16>
    %118 = arith.truncf %116 : vector<16x64xf32> to vector<16x64xbf16>
    %cst_35 = arith.constant dense<0.000000e+00> : vector<8x64xf32>
    %119 = tpu.matmul %117, %118, %cst_35 {dimension_numbers = #tpu.dot_dimension_numbers<[1], [0], [0], [1], [0, 0, 1, 1], [], []>} : vector<8x16xbf16>, vector<16x64xbf16>, vector<8x64xf32> -> vector<8x64xf32>
    %120 = arith.addf %93, %119 : vector<8x64xf32>
    %c0_36 = arith.constant 0 : index
    %c0_37 = arith.constant 0 : index
    %121 = vector.load %arg6[%c0_36, %c0_37] : memref<1x64xf32, #tpu.memory_space<vmem>>, vector<1x64xf32>
    %122 = vector.broadcast %121 : vector<1x64xf32> to vector<8x64xf32>
    %123 = arith.addf %120, %122 : vector<8x64xf32>
    %124 = arith.addf %1, %123 : vector<8x64xf32>
    %c0_38 = arith.constant 0 : index
    %c0_39 = arith.constant 0 : index
    %125 = vector.load %arg11[%c0_38, %c0_39] : memref<1x64xf32, #tpu.memory_space<vmem>>, vector<1x64xf32>
    %c0_40 = arith.constant 0 : index
    %c0_41 = arith.constant 0 : index
    %126 = vector.load %arg12[%c0_40, %c0_41] : memref<1x64xf32, #tpu.memory_space<vmem>>, vector<1x64xf32>
    %cst_42 = arith.constant dense<0.000000e+00> : vector<8xf32>
    %127 = vector.multi_reduction <add>, %124, %cst_42 [1] : vector<8x64xf32> to vector<8xf32>
    %128 = vector.shape_cast %127 : vector<8xf32> to vector<8x1xf32>
    %cst_43 = arith.constant 6.400000e+01 : f32
    %129 = vector.broadcast %cst_43 : f32 to vector<8x1xf32>
    %130 = arith.divf %128, %129 : vector<8x1xf32>
    %131 = vector.broadcast %130 : vector<8x1xf32> to vector<8x64xf32>
    %132 = arith.subf %124, %131 : vector<8x64xf32>
    %133 = arith.mulf %132, %132 : vector<8x64xf32>
    %cst_44 = arith.constant dense<0.000000e+00> : vector<8xf32>
    %134 = vector.multi_reduction <add>, %133, %cst_44 [1] : vector<8x64xf32> to vector<8xf32>
    %135 = vector.shape_cast %134 : vector<8xf32> to vector<8x1xf32>
    %cst_45 = arith.constant 6.400000e+01 : f32
    %136 = vector.broadcast %cst_45 : f32 to vector<8x1xf32>
    %137 = arith.divf %135, %136 : vector<8x1xf32>
    %cst_46 = arith.constant 9.99999974E-6 : f32
    %138 = vector.broadcast %cst_46 : f32 to vector<8x1xf32>
    %139 = arith.addf %137, %138 : vector<8x1xf32>
    %140 = math.rsqrt %139 : vector<8x1xf32>
    %141 = vector.broadcast %140 : vector<8x1xf32> to vector<8x64xf32>
    %142 = arith.mulf %132, %141 : vector<8x64xf32>
    %143 = vector.broadcast %125 : vector<1x64xf32> to vector<8x64xf32>
    %144 = arith.mulf %142, %143 : vector<8x64xf32>
    %145 = vector.broadcast %126 : vector<1x64xf32> to vector<8x64xf32>
    %146 = arith.addf %144, %145 : vector<8x64xf32>
    %c0_47 = arith.constant 0 : index
    %c0_48 = arith.constant 0 : index
    %147 = vector.load %arg7[%c0_47, %c0_48] : memref<64x64xf32, #tpu.memory_space<vmem>>, vector<64x64xf32>
    %148 = arith.truncf %146 : vector<8x64xf32> to vector<8x64xbf16>
    %149 = arith.truncf %147 : vector<64x64xf32> to vector<64x64xbf16>
    %cst_49 = arith.constant dense<0.000000e+00> : vector<8x64xf32>
    %150 = tpu.matmul %148, %149, %cst_49 {dimension_numbers = #tpu.dot_dimension_numbers<[1], [0], [0], [1], [0, 0, 1, 1], [], []>} : vector<8x64xbf16>, vector<64x64xbf16>, vector<8x64xf32> -> vector<8x64xf32>
    %c0_50 = arith.constant 0 : index
    %c0_51 = arith.constant 0 : index
    %151 = vector.load %arg8[%c0_50, %c0_51] : memref<1x64xf32, #tpu.memory_space<vmem>>, vector<1x64xf32>
    %152 = vector.broadcast %151 : vector<1x64xf32> to vector<8x64xf32>
    %153 = arith.addf %150, %152 : vector<8x64xf32>
    %cst_52 = arith.constant 0.000000e+00 : f32
    %154 = vector.broadcast %cst_52 : f32 to vector<8x64xf32>
    %155 = arith.maximumf %153, %154 : vector<8x64xf32>
    %c0_53 = arith.constant 0 : index
    %c0_54 = arith.constant 0 : index
    %156 = vector.load %arg9[%c0_53, %c0_54] : memref<64x64xf32, #tpu.memory_space<vmem>>, vector<64x64xf32>
    %157 = arith.truncf %155 : vector<8x64xf32> to vector<8x64xbf16>
    %158 = arith.truncf %156 : vector<64x64xf32> to vector<64x64xbf16>
    %cst_55 = arith.constant dense<0.000000e+00> : vector<8x64xf32>
    %159 = tpu.matmul %157, %158, %cst_55 {dimension_numbers = #tpu.dot_dimension_numbers<[1], [0], [0], [1], [0, 0, 1, 1], [], []>} : vector<8x64xbf16>, vector<64x64xbf16>, vector<8x64xf32> -> vector<8x64xf32>
    %c0_56 = arith.constant 0 : index
    %c0_57 = arith.constant 0 : index
    %160 = vector.load %arg10[%c0_56, %c0_57] : memref<1x64xf32, #tpu.memory_space<vmem>>, vector<1x64xf32>
    %161 = vector.broadcast %160 : vector<1x64xf32> to vector<8x64xf32>
    %162 = arith.addf %159, %161 : vector<8x64xf32>
    %163 = arith.addf %146, %162 : vector<8x64xf32>
    %c0_58 = arith.constant 0 : index
    %c0_59 = arith.constant 0 : index
    %164 = vector.load %arg13[%c0_58, %c0_59] : memref<1x64xf32, #tpu.memory_space<vmem>>, vector<1x64xf32>
    %c0_60 = arith.constant 0 : index
    %c0_61 = arith.constant 0 : index
    %165 = vector.load %arg14[%c0_60, %c0_61] : memref<1x64xf32, #tpu.memory_space<vmem>>, vector<1x64xf32>
    %cst_62 = arith.constant dense<0.000000e+00> : vector<8xf32>
    %166 = vector.multi_reduction <add>, %163, %cst_62 [1] : vector<8x64xf32> to vector<8xf32>
    %167 = vector.shape_cast %166 : vector<8xf32> to vector<8x1xf32>
    %cst_63 = arith.constant 6.400000e+01 : f32
    %168 = vector.broadcast %cst_63 : f32 to vector<8x1xf32>
    %169 = arith.divf %167, %168 : vector<8x1xf32>
    %170 = vector.broadcast %169 : vector<8x1xf32> to vector<8x64xf32>
    %171 = arith.subf %163, %170 : vector<8x64xf32>
    %172 = arith.mulf %171, %171 : vector<8x64xf32>
    %cst_64 = arith.constant dense<0.000000e+00> : vector<8xf32>
    %173 = vector.multi_reduction <add>, %172, %cst_64 [1] : vector<8x64xf32> to vector<8xf32>
    %174 = vector.shape_cast %173 : vector<8xf32> to vector<8x1xf32>
    %cst_65 = arith.constant 6.400000e+01 : f32
    %175 = vector.broadcast %cst_65 : f32 to vector<8x1xf32>
    %176 = arith.divf %174, %175 : vector<8x1xf32>
    %cst_66 = arith.constant 9.99999974E-6 : f32
    %177 = vector.broadcast %cst_66 : f32 to vector<8x1xf32>
    %178 = arith.addf %176, %177 : vector<8x1xf32>
    %179 = math.rsqrt %178 : vector<8x1xf32>
    %180 = vector.broadcast %179 : vector<8x1xf32> to vector<8x64xf32>
    %181 = arith.mulf %171, %180 : vector<8x64xf32>
    %182 = vector.broadcast %164 : vector<1x64xf32> to vector<8x64xf32>
    %183 = arith.mulf %181, %182 : vector<8x64xf32>
    %184 = vector.broadcast %165 : vector<1x64xf32> to vector<8x64xf32>
    %185 = arith.addf %183, %184 : vector<8x64xf32>
    %c0_67 = arith.constant 0 : index
    %c0_68 = arith.constant 0 : index
    %c0_69 = arith.constant 0 : index
    %186 = vector.load %arg15[%c0_67, %c0_68, %c0_69] : memref<1x8x64xf32, #tpu.memory_space<vmem>>, vector<1x8x64xf32>
    %187 = vector.shape_cast %186 : vector<1x8x64xf32> to vector<8x64xf32>
    %188 = vector.shape_cast %185 : vector<8x64xf32> to vector<1x8x64xf32>
    tpu.vector_store %arg15[%c0_67, %c0_68, %c0_69], %188 {strides = array<i32>} : memref<1x8x64xf32, #tpu.memory_space<vmem>>, vector<1x8x64xf32>,
    return
  }
  func.func @transform_0(%arg0: i32) -> (i32, i32, i32) {
    %c0_i32 = arith.constant 0 : i32
    %c0_i32_0 = arith.constant 0 : i32
    %c0_i32_1 = arith.constant 0 : i32
    return %arg0, %c0_i32, %c0_i32_0 : i32, i32, i32
  }
  func.func @transform_1(%arg0: i32) -> (i32, i32, i32) {
    %c0_i32 = arith.constant 0 : i32
    %c0_i32_0 = arith.constant 0 : i32
    %c0_i32_1 = arith.constant 0 : i32
    return %arg0, %c0_i32, %c0_i32_0 : i32, i32, i32
  }
  func.func @transform_2(%arg0: i32) -> (i32, i32) {
    %c0_i32 = arith.constant 0 : i32
    %c0_i32_0 = arith.constant 0 : i32
    %c0_i32_1 = arith.constant 0 : i32
    return %c0_i32, %c0_i32_0 : i32, i32
  }
  func.func @transform_3(%arg0: i32) -> (i32, i32) {
    %c0_i32 = arith.constant 0 : i32
    %c0_i32_0 = arith.constant 0 : i32
    %c0_i32_1 = arith.constant 0 : i32
    return %c0_i32, %c0_i32_0 : i32, i32
  }
  func.func @transform_4(%arg0: i32) -> (i32, i32) {
    %c0_i32 = arith.constant 0 : i32
    %c0_i32_0 = arith.constant 0 : i32
    %c0_i32_1 = arith.constant 0 : i32
    return %c0_i32, %c0_i32_0 : i32, i32
  }
  func.func @transform_5(%arg0: i32) -> (i32, i32) {
    %c0_i32 = arith.constant 0 : i32
    %c0_i32_0 = arith.constant 0 : i32
    %c0_i32_1 = arith.constant 0 : i32
    return %c0_i32, %c0_i32_0 : i32, i32
  }
  func.func @transform_6(%arg0: i32) -> (i32, i32) {
    %c0_i32 = arith.constant 0 : i32
    %c0_i32_0 = arith.constant 0 : i32
    %c0_i32_1 = arith.constant 0 : i32
    return %c0_i32, %c0_i32_0 : i32, i32
  }
  func.func @transform_7(%arg0: i32) -> (i32, i32) {
    %c0_i32 = arith.constant 0 : i32
    %c0_i32_0 = arith.constant 0 : i32
    %c0_i32_1 = arith.constant 0 : i32
    return %c0_i32, %c0_i32_0 : i32, i32
  }
  func.func @transform_8(%arg0: i32) -> (i32, i32) {
    %c0_i32 = arith.constant 0 : i32
    %c0_i32_0 = arith.constant 0 : i32
    %c0_i32_1 = arith.constant 0 : i32
    return %c0_i32, %c0_i32_0 : i32, i32
  }
  func.func @transform_9(%arg0: i32) -> (i32, i32) {
    %c0_i32 = arith.constant 0 : i32
    %c0_i32_0 = arith.constant 0 : i32
    %c0_i32_1 = arith.constant 0 : i32
    return %c0_i32, %c0_i32_0 : i32, i32
  }
  func.func @transform_10(%arg0: i32) -> (i32, i32) {
    %c0_i32 = arith.constant 0 : i32
    %c0_i32_0 = arith.constant 0 : i32
    %c0_i32_1 = arith.constant 0 : i32
    return %c0_i32, %c0_i32_0 : i32, i32
  }
  func.func @transform_11(%arg0: i32) -> (i32, i32) {
    %c0_i32 = arith.constant 0 : i32
    %c0_i32_0 = arith.constant 0 : i32
    %c0_i32_1 = arith.constant 0 : i32
    return %c0_i32, %c0_i32_0 : i32, i32
  }
  func.func @transform_12(%arg0: i32) -> (i32, i32) {
    %c0_i32 = arith.constant 0 : i32
    %c0_i32_0 = arith.constant 0 : i32
    %c0_i32_1 = arith.constant 0 : i32
    return %c0_i32, %c0_i32_0 : i32, i32
  }
  func.func @transform_13(%arg0: i32) -> (i32, i32) {
    %c0_i32 = arith.constant 0 : i32
    %c0_i32_0 = arith.constant 0 : i32
    %c0_i32_1 = arith.constant 0 : i32
    return %c0_i32, %c0_i32_0 : i32, i32
  }
  func.func @transform_14(%arg0: i32) -> (i32, i32, i32) {
    %c0_i32 = arith.constant 0 : i32
    %c0_i32_0 = arith.constant 0 : i32
    %c0_i32_1 = arith.constant 0 : i32
    return %arg0, %c0_i32, %c0_i32_0 : i32, i32, i32
  }
}

module attributes {stable_mosaic.version = 11 : i64} {
  func.func @_out_linear_kernel(%arg0: i32, %arg1: memref<16x64xf32, #tpu.memory_space<vmem>>, %arg2: memref<64x9xf32, #tpu.memory_space<vmem>>, %arg3: memref<1x9xf32, #tpu.memory_space<vmem>>, %arg4: memref<16x9xf32, #tpu.memory_space<vmem>>) attributes {dimension_semantics = [#tpu.dimension_semantics<arbitrary>], iteration_bounds = array<i64: 1>, scalar_prefetch = 0 : i64, scratch_operands = 0 : i64, tpu.core_type = #tpu.core_type<tc>, window_params = [{pipeline_mode = #tpu.pipeline_mode<synchronous>, transform_indices = @transform_0, window_bounds = array<i64: 16, 64>}, {pipeline_mode = #tpu.pipeline_mode<synchronous>, transform_indices = @transform_1, window_bounds = array<i64: 64, 9>}, {pipeline_mode = #tpu.pipeline_mode<synchronous>, transform_indices = @transform_2, window_bounds = array<i64: 1, 9>}, {pipeline_mode = #tpu.pipeline_mode<synchronous>, transform_indices = @transform_3, window_bounds = array<i64: 16, 9>}]} {
    %c0 = arith.constant 0 : index
    %c0_0 = arith.constant 0 : index
    %0 = vector.load %arg1[%c0, %c0_0] : memref<16x64xf32, #tpu.memory_space<vmem>>, vector<16x64xf32>
    %c0_1 = arith.constant 0 : index
    %c0_2 = arith.constant 0 : index
    %1 = vector.load %arg2[%c0_1, %c0_2] : memref<64x9xf32, #tpu.memory_space<vmem>>, vector<64x9xf32>
    %2 = arith.truncf %0 : vector<16x64xf32> to vector<16x64xbf16>
    %3 = arith.truncf %1 : vector<64x9xf32> to vector<64x9xbf16>
    %cst = arith.constant dense<0.000000e+00> : vector<16x9xf32>
    %4 = tpu.matmul %2, %3, %cst {dimension_numbers = #tpu.dot_dimension_numbers<[1], [0], [0], [1], [0, 0, 1, 1], [], []>} : vector<16x64xbf16>, vector<64x9xbf16>, vector<16x9xf32> -> vector<16x9xf32>
    %c0_3 = arith.constant 0 : index
    %c0_4 = arith.constant 0 : index
    %5 = vector.load %arg3[%c0_3, %c0_4] : memref<1x9xf32, #tpu.memory_space<vmem>>, vector<1x9xf32>
    %6 = vector.broadcast %5 : vector<1x9xf32> to vector<16x9xf32>
    %7 = arith.addf %4, %6 : vector<16x9xf32>
    %8 = arith.negf %7 : vector<16x9xf32>
    %9 = math.exp %8 : vector<16x9xf32>
    %cst_5 = arith.constant 1.000000e+00 : f32
    %10 = vector.broadcast %cst_5 : f32 to vector<16x9xf32>
    %11 = arith.addf %10, %9 : vector<16x9xf32>
    %12 = arith.divf %10, %11 : vector<16x9xf32>
    %c0_6 = arith.constant 0 : index
    %c0_7 = arith.constant 0 : index
    %13 = vector.load %arg4[%c0_6, %c0_7] : memref<16x9xf32, #tpu.memory_space<vmem>>, vector<16x9xf32>
    tpu.vector_store %arg4[%c0_6, %c0_7], %12 {strides = array<i32>} : memref<16x9xf32, #tpu.memory_space<vmem>>, vector<16x9xf32>,
    return
  }
  func.func @transform_0(%arg0: i32) -> (i32, i32) {
    %c0_i32 = arith.constant 0 : i32
    %c0_i32_0 = arith.constant 0 : i32
    %c0_i32_1 = arith.constant 0 : i32
    return %c0_i32, %c0_i32_0 : i32, i32
  }
  func.func @transform_1(%arg0: i32) -> (i32, i32) {
    %c0_i32 = arith.constant 0 : i32
    %c0_i32_0 = arith.constant 0 : i32
    %c0_i32_1 = arith.constant 0 : i32
    return %c0_i32, %c0_i32_0 : i32, i32
  }
  func.func @transform_2(%arg0: i32) -> (i32, i32) {
    %c0_i32 = arith.constant 0 : i32
    %c0_i32_0 = arith.constant 0 : i32
    %c0_i32_1 = arith.constant 0 : i32
    return %c0_i32, %c0_i32_0 : i32, i32
  }
  func.func @transform_3(%arg0: i32) -> (i32, i32) {
    %c0_i32 = arith.constant 0 : i32
    %c0_i32_0 = arith.constant 0 : i32
    %c0_i32_1 = arith.constant 0 : i32
    return %c0_i32, %c0_i32_0 : i32, i32
  }
}

</mosaic_0001>

<bundles_post_ra>
// kernel: forward.4
= control target key start
LH: loop header
LB: loop body
LE: loop exit
PB: predicated region body
PF: predicated region fallthrough
CT: control target
= control target key end

     0   :  { %13 = vsyncpa [#allocation3], 0  ;;  %s155_s27 = smov [#allocation2]   ;;  %s156_s29 = smov 128   ;;  %s229_s0 = inlined_call_operand.vmem [shape: f32[2,4], index: 0, kind: input, shape index: {}]   ;;  %s230_s1 = inlined_call_operand.vmem [shape: f32[4,64], index: 1, kind: input, shape index: {}]   ;;  %s231_s2 = inlined_call_operand.vmem [shape: f32[1,64], index: 2, kind: input, shape index: {}]   ;;  %s232_s3 = inlined_call_operand.vmem [shape: f32[14,9], index: 3, kind: input, shape index: {}]   ;;  %s233_s4 = inlined_call_operand.hbm [shape: f32[9,64], index: 4, kind: input, shape index: {}]   ;;  %s234_s5 = inlined_call_operand.vmem [shape: f32[1,64], index: 5, kind: input, shape index: {}]   ;;  %s235_s6 = inlined_call_operand.vmem [shape: f32[2,64], index: 6, kind: output, shape index: {0}]   ;;  %s236_s7 = inlined_call_operand.vmem [shape: f32[14,64], index: 7, kind: output, shape index: {1}]  }
   0x1   :  { %s26_s26 = sshll.u32 %s233_s4, 4  ;;  %s28_s28 = sshll.u32 %s155_s27, 4  ;;  %s27_s26 = int_to_ptr.hbm [resolvable:$true] %s26_s26  ;;  %s29_s28 = int_to_ptr.vmem [resolvable:$true] %s28_s28 }
   0x2   :  { %s157_s30 = smov 8  }
   0x3   :  { %34 = dma.hbm_to_vmem [thread:$0]  %s27_s26, 256, %s29_s28, [#allocation3], %s156_s29, %s156_s29, %s157_s30  }
   0x4   :  { %153 = dma.done.wait [#allocation3], 256  }
   0x5   :  { %154 = vsyncadd [#allocation3], 4294967040  ;;  %vm87_vm0 = vcmask 1043456   ;;  %vm88_vm1 = vcmask 1044480   ;;  %v158_v0 = vmov 65535   ;;  %vm54_vm2 = vcmask 1041408  }
   0x6   :  { %v89_v1 = vsel %vm87_vm0, 4294967295, %v158_v0  ;;  %v43_v2 = vld [vmem:[%s230_s1] sm:$0xf]  ;;  %v76_v4 = vld [vmem:[#allocation2 + $0x8] sm:$0x1]  ;;  %vm50_vm3 = vcmask 31744  }
   0x7   :  { %v75_v3 = vld [vmem:[#allocation2] sm:$0xff]  ;;  %v90_v5 = vsel %vm88_vm1, %v89_v1, 0  ;;  %v45_v6 = vpack.c.bf16 %v43_v2, %v43_v2  ;;  %v74_v10 = vld [vmem:[%s232_s3 + $0x8] sm:$0x3f]  ;;  %vm83_vm4 = vcmask 72704   ;;  %vm71_vm5 = vcmask 517120  }
   0x8   :  { %v78_v7 = vpack.c.bf16 %v76_v4, %v75_v3  ;;  %v42_v8 = vld [vmem:[%s229_s0] sm:$0x3]  ;;  %vm108_vm6 = vcmask 523264   ;;  %vm110_vm7 = vcmask 521216  }
   0x9   :  { %v73_v9 = vld [vmem:[%s232_s3] sm:$0xff]  ;;  %v56_v11 = vsel %vm54_vm2, %v45_v6, 0  ;;  %v44_v13 = vpack.c.bf16 %v42_v8, %v42_v8 }
   0xa   :  { %v92_v12 = vand.u32 %v90_v5, %v78_v7  ;;  %65 = vmatpush.bf16.msra.mxu0 %v56_v11  ;;  %v77_v14 = vpack.c.bf16 %v74_v10, %v73_v9  ;;  %v127_v15 = vld [vmem:[%s231_s2] ss:$0 sm:$0xff] }
   0xb   :  { %v128_v16 = vld [vmem:[%s234_s5] ss:$0 sm:$0xff] }
   0xc   :  { %101 = vmatpush.bf16.msra.mxu1 %v92_v12 }
   0xd   :  { %121 = vmatmul.msk.bf16.vlgmr.msra.gmra.mxu0 %vm50_vm3, %v44_v13 }
   0xf   :  { %122 = vmatmul.msk.bf16.vlgmr.msra.gmra.mxu1 %vm83_vm4, %v77_v14 }
  0x8a   :  { %v67_v17 = vpop.f32.mrf.mxu0 }
  0x8b   :  { %v68_v18 = vadd.f32 %v127_v15, %v67_v17 }
  0x8c   :  { %v103_v19 = vpop.f32.mrf.mxu1 }
  0x8d   :  { %v104_v20 = vadd.f32 %v128_v16, %v103_v19  ;;  %72 = vst.msk [vmem:[%s235_s6] sm:$0x3] %vm71_vm5, %v68_v18 }
  0x8f   :  { %109 = vst.msk [vmem:[%s236_s7] sm:$0xff] %vm108_vm6, %v104_v20 }
  0x92   :  { %v69_v21 = vpop.f32.mrf.mxu0 }
  0x94   :  { %v105_v22 = vpop.f32.mrf.mxu1 }
  0x95   :  { %v106_v23 = vadd.f32 %v128_v16, %v105_v22 }
  0x97   :  { %111 = vst.msk [vmem:[%s236_s7 + $0x8] sm:$0x3f] %vm110_vm7, %v106_v23 }
  0x98   :  { %120 = vsyncpa [#allocation3], 1 }

// kernel: forward.7
= control target key start
LH: loop header
LB: loop body
LE: loop exit
PB: predicated region body
PF: predicated region fallthrough
CT: control target
= control target key end

     0   :  { %vm34_vm0 = vcmask 523264   ;;  %vm90_vm4 = vcmask 72704   ;;  %s170_s1 = inlined_call_operand.vmem [shape: f32[64,9], index: 1, kind: input, shape index: {}]   ;;  %s171_s2 = inlined_call_operand.vmem [shape: f32[1,9], index: 2, kind: input, shape index: {}]   ;;  %s172_s0 = inlined_call_operand.vmem [shape: f32[16,64], index: 0, kind: input, shape index: {}]   ;;  %s173_s3 = inlined_call_operand.vmem [shape: f32[16,9], index: 3, kind: output, shape index: {}]  }
   0x1   :  { %v23_v0 = vld [vmem:[%s170_s1 + $0x30] sm:$0xff]  ;;  %v24_v1 = vld [vmem:[%s170_s1 + $0x38] sm:$0xff]  ;;  %v21_v2 = vld [vmem:[%s170_s1 + $0x20] sm:$0xff] }
   0x2   :  { %v29_v3 = vpack.c.bf16 %v24_v1, %v23_v0  ;;  %v22_v4 = vld [vmem:[%s170_s1 + $0x28] sm:$0xff]  ;;  %v19_v6 = vld [vmem:[%s170_s1 + $0x10] sm:$0xff]  ;;  %v20_v7 = vld [vmem:[%s170_s1 + $0x18] sm:$0xff] }
   0x3   :  { %v28_v5 = vpack.c.bf16 %v22_v4, %v21_v2  ;;  %v27_v8 = vpack.c.bf16 %v20_v7, %v19_v6  ;;  %v17_v9 = vld [vmem:[%s170_s1] sm:$0xff]  ;;  %v18_v10 = vld [vmem:[%s170_s1 + $0x8] sm:$0xff] }
   0x4   :  { %42 = vmatpush.bf16.msra.mxu0 %v29_v3  ;;  %v26_v11 = vpack.c.bf16 %v18_v10, %v17_v9  ;;  %v15_v12 = vld [vmem:[%s172_s0] sm:$0xff]  ;;  %v16_v13 = vld [vmem:[%s172_s0 + $0x8] sm:$0xff] }
   0x5   :  { %v25_v14 = vpack.c.bf16 %v16_v13, %v15_v12  ;;  %v100_v15 = vld [vmem:[%s171_s2] ss:$0 sm:$0xff] }
   0x8   :  { %43 = vmatpush.bf16.msra.mxu0 %v28_v5 }
   0xc   :  { %44 = vmatpush.bf16.msra.mxu0 %v27_v8 }
  0x10   :  { %45 = vmatpush.bf16.msra.mxu0 %v26_v11 }
  0x13   :  { %97 = vmatmul.msk.bf16.vlgmr.msra.gmra.mxu0 %vm34_vm0, %v25_v14 }
  0x90   :  { %v47_v16 = vpop.f32.mrf.mxu0 }
  0x91   :  { %v48_v17 = vadd.f32 %v100_v15, %v47_v16 }
  0x93   :  { %v98_v18 = vmul.f32 -1.442695, %v48_v17 }
  0x95   :  { %101 = vpow2.f32 %v98_v18 }
  0x98   :  { %v49_v19 = vpop.f32.mrf.mxu0 }
  0x99   :  { %v50_v20 = vadd.f32 %v100_v15, %v49_v19 }
  0x9b   :  { %v102_v21 = vpop.eup %101  ;;  %v99_v22 = vmul.f32 -1.442695, %v50_v20 }
  0x9c   :  { %v58_v23 = vadd.f32 1.0, %v102_v21 }
  0x9d   :  { %103 = vpow2.f32 %v99_v22 }
  0x9e   :  { %105 = vrcp.f32 %v58_v23  ;;  %v71_v29 = vand.u32 2147483648, %v58_v23  ;;  %v69_v31 = vand.u32 2147483647, %v58_v23  ;;  %vm65_vm2 = vweird.f32 %v58_v23 }
  0xa0   :  { %v72_v34 = vor.u32 1.1754944e-38, %v71_v29  ;;  %vm70_vm5 = vcmp.eq.f32.partialorder %v69_v31, 8.507059e+37 }
  0xa3   :  { %v104_v24 = vpop.eup %103 }
  0xa4   :  { %v106_v25 = vpop.eup %105  ;;  %v59_v26 = vadd.f32 1.0, %v104_v24 }
  0xa5   :  { %v61_v27 = vmul.f32 %v106_v25, %v58_v23  ;;  %vm66_vm1 = vweird.f32 %v106_v25 }
  0xa6   :  { %107 = vrcp.f32 %v59_v26  ;;  %vm67_vm3 = vmor %vm65_vm2, %vm66_vm1  ;;  %v86_v39 = vand.u32 2147483648, %v59_v26  ;;  %v84_v41 = vand.u32 2147483647, %v59_v26  ;;  %vm80_vm7 = vweird.f32 %v59_v26 }
  0xa7   :  { %v62_v28 = vsub.f32 1.0, %v61_v27 }
  0xa8   :  { %v87_v43 = vor.u32 1.1754944e-38, %v86_v39  ;;  %vm85_vm9 = vcmp.eq.f32.partialorder %v84_v41, 8.507059e+37 }
  0xa9   :  { %v63_v30 = vmul.f32 %v106_v25, %v62_v28 }
  0xab   :  { %v64_v32 = vadd.f32 %v106_v25, %v63_v30 }
  0xac   :  { %v108_v33 = vpop.eup %107 }
  0xad   :  { %v68_v35 = vsel %vm67_vm3, %v106_v25, %v64_v32  ;;  %v76_v36 = vmul.f32 %v108_v33, %v59_v26  ;;  %vm81_vm6 = vweird.f32 %v108_v33 }
  0xae   :  { %v73_v37 = vsel %vm70_vm5, %v72_v34, %v68_v35  ;;  %vm82_vm8 = vmor %vm80_vm7, %vm81_vm6 }
  0xaf   :  { %91 = vst.msk [vmem:[%s173_s3] sm:$0xff] %vm90_vm4, %v73_v37  ;;  %v77_v38 = vsub.f32 1.0, %v76_v36 }
  0xb1   :  { %v78_v40 = vmul.f32 %v108_v33, %v77_v38 }
  0xb3   :  { %v79_v42 = vadd.f32 %v108_v33, %v78_v40 }
  0xb5   :  { %v83_v44 = vsel %vm82_vm8, %v108_v33, %v79_v42 }
  0xb6   :  { %v88_v45 = vsel %vm85_vm9, %v87_v43, %v83_v44 }
  0xb7   :  { %92 = vst.msk [vmem:[%s173_s3 + $0x8] sm:$0xff] %vm90_vm4, %v88_v45 }

// kernel: forward.5
= control target key start
LH: loop header
LB: loop body
LE: loop exit
PB: predicated region body
PF: predicated region fallthrough
CT: control target
= control target key end

     0   :  { %19 = vsyncpa [#allocation3], 0  ;;  %s1688_s0 = inlined_call_operand.vmem [shape: f32[2,8,64], index: 0, kind: input, shape index: {}]   ;;  %s1689_s1 = inlined_call_operand.vmem [shape: f32[2,8,8], index: 1, kind: input, shape index: {}]   ;;  %s1690_s2 = inlined_call_operand.vmem [shape: f32[64,192], index: 2, kind: input, shape index: {}]   ;;  %s1691_s3 = inlined_call_operand.vmem [shape: f32[1,192], index: 3, kind: input, shape index: {}]   ;;  %s1692_s4 = inlined_call_operand.vmem [shape: f32[64,64], index: 4, kind: input, shape index: {}]   ;;  %s1693_s5 = inlined_call_operand.vmem [shape: f32[1,64], index: 5, kind: input, shape index: {}]   ;;  %s1694_s6 = inlined_call_operand.hbm [shape: f32[64,64], index: 6, kind: input, shape index: {}]   ;;  %s1695_s7 = inlined_call_operand.vmem [shape: f32[1,64], index: 7, kind: input, shape index: {}]   ;;  %s1696_s8 = inlined_call_operand.hbm [shape: f32[64,64], index: 8, kind: input, shape index: {}]   ;;  %s1697_s9 = inlined_call_operand.hbm [shape: f32[1,64], index: 9, kind: input, shape index: {}]   ;;  %s1698_s10 = inlined_call_operand.vmem [shape: f32[1,64], index: 10, kind: input, shape index: {}]   ;;  %s1699_s11 = inlined_call_operand.vmem [shape: f32[1,64], index: 11, kind: input, shape index: {}]   ;;  %s1700_s12 = inlined_call_operand.vmem [shape: f32[1,64], index: 12, kind: input, shape index: {}]   ;;  %s1701_s13 = inlined_call_operand.vmem [shape: f32[1,64], index: 13, kind: input, shape index: {}]   ;;  %s1702_s14 = inlined_call_operand.vmem [shape: f32[2,8,64], index: 14, kind: output, shape index: {}]  }
   0x1   :  { %20 = vsyncpa [#allocation5], 0  ;;  %s1455_s29 = smov 0  }
   0x2 LB: > { %s1461_s30 = sadd.s32 4294967295, %s1365_s29   ;;  %p1153_p0 = scmp.ge.s32.totalorder %s1365_s29, 1  ;;  %s1365_s29 = sphi %s1455_s29, %s26_s29  }
   0x3   : > { %p361_p1 = scmp.lt.s32.totalorder %s1365_s29, 3  ;;  %p1205_p2 = scmp.eq.s32.totalorder %s1461_s30, 0 }
   0x4   : > { %s401_s17 = sshll.u32 %s1696_s8, 4  ;;  %s384_s21 = sshll.u32 %s1694_s6, 4  ;;  %s402_s17 = int_to_ptr.hbm [resolvable:$true] %s401_s17  ;;  %s385_s21 = int_to_ptr.hbm [resolvable:$true] %s384_s21 }
   0x5   : > { %p1469_p3 = pnand %p1153_p0, %p361_p1  ;;  %s1367_s22 = smov [#allocation4]  }
   0x6   : > { %s403_s23 = sshll.u32 %s1367_s22, 4  ;;  %s1368_s24 = smov [#allocation2]   ;;  %s404_s23 = int_to_ptr.vmem [resolvable:$true] %s403_s23 }
   0x7   : > { %p1195_p4 = pneg %p1469_p3  ;;  %s386_s25 = sshll.u32 %s1368_s24, 4  ;;  %s387_s25 = int_to_ptr.vmem [resolvable:$true] %s386_s25 }
   0x8   : > { %s416_s28 = sshll.u32 %s1697_s9, 4  ;;  %s1369_s15 = smov 128   ;;  %s417_s28 = int_to_ptr.hbm [resolvable:$true] %s416_s28 }
   0x9   : > { %p1196_p5 = pnand %p1205_p2, %p1195_p4  ;;  %s1370_s16 = smov 8  }
   0xa   : > { %s1371_s19 = smov [#allocation6]   ;;  %457 = sbr.rel (%p1469_p3) target bundleno = 2307 (0x903), region = 76 }
   0xb   : > { %1201 = dma.hbm_to_vmem [thread:$0]  (!%p1196_p5), %s402_s17, 1024, %s404_s23, [#allocation5], %s1369_s15, %s1369_s15, %s1370_s16  }
   0xc   : > { %1198 = dma.hbm_to_vmem [thread:$0]  (!%p1196_p5), %s385_s21, 1024, %s387_s25, [#allocation3], %s1369_s15, %s1369_s15, %s1370_s16  }
   0xd   : > { %s418_s20 = sshll.u32 %s1371_s19, 4  ;;  %s419_s20 = int_to_ptr.vmem [resolvable:$true] %s418_s20 }
   0xe   : > { %1204 = dma.hbm_to_vmem [thread:$0]  (!%p1196_p5), %s417_s28, 16, %s419_s20, [#allocation5]  }
   0xf   : > { %1356 = dma.done.wait (%p1205_p2), [#allocation3], 1024  }
  0x10   : > { %1358 = vsyncadd (%p1205_p2), [#allocation3], 4294966272 }
  0x11   : > { %1360 = dma.done.wait (%p1205_p2), [#allocation5], 1040  }
  0x12   : > { %1362 = vsyncadd (%p1205_p2), [#allocation5], 4294966256  ;;  %p516_p6 = scmp.lt.s32.totalorder %s1461_s30, 1  ;;  %v543_v0 = vld [vmem:[%s1690_s2 + $0x60] sm:$0xff]  ;;  %v545_v1 = vld [vmem:[%s1690_s2 + $0x70] sm:$0xff]  ;;  %vm562_vm0 = vcmask 523264  }
  0x13   : > { %v539_v2 = vld [vmem:[%s1690_s2 + $0x40] sm:$0xff]  ;;  %v554_v3 = vpack.c.bf16 %v545_v1, %v543_v0  ;;  %v541_v4 = vld [vmem:[%s1690_s2 + $0x50] sm:$0xff]  ;;  %s1372_s26 = smov 112   ;;  %s1373_s27 = smov 64   ;;  %v544_v20 = vld [vmem:[%s1690_s2 + $0x68] sm:$0xff]  ;;  %vm604_vm1 = vcmask 130048  }
  0x14   : > { %s1705_s30 = smov (!%p516_p6, %s1461_s30), 1  ;;  %v552_v5 = vpack.c.bf16 %v541_v4, %v539_v2  ;;  %v535_v6 = vld [vmem:[%s1690_s2 + $0x20] sm:$0xff]  ;;  %v537_v7 = vld [vmem:[%s1690_s2 + $0x30] sm:$0xff]  ;;  %s1374_s28 = smov 32   ;;  %v546_v21 = vld [vmem:[%s1690_s2 + $0x78] sm:$0xff]  ;;  %vm626_vm2 = vcmask 64512  }
  0x15   : > { %570 = vmatpush.bf16.msra.mxu0 %v554_v3  ;;  %s1513_s19 = sshll.u32 %s1705_s30, 3  ;;  %v550_v8 = vpack.c.bf16 %v537_v7, %v535_v6  ;;  %v531_v9 = vld [vmem:[%s1690_s2] sm:$0xff]  ;;  %v533_v10 = vld [vmem:[%s1690_s2 + $0x10] sm:$0xff]  ;;  %s1375_s15 = smov 16   ;;  %v555_v22 = vpack.c.bf16 %v546_v21, %v544_v20  ;;  %v540_v23 = vld [vmem:[%s1690_s2 + $0x48] sm:$0xff]  ;;  %vm643_vm3 = vcmask 1043456  }
  0x16   : > { %s519_s24 = scalar_lea.vmem %s1688_s0, %s1513_s19  ;;  %v548_v11 = vpack.c.bf16 %v533_v10, %v531_v9  ;;  %v1533_v14 = vld [vmem:[%s1691_s3] sm:$0x3]  ;;  %s1376_s16 = smov 96   ;;  %v542_v24 = vld [vmem:[%s1690_s2 + $0x58] sm:$0xff]  ;;  %v536_v26 = vld [vmem:[%s1690_s2 + $0x28] sm:$0xff] }
  0x17   : > { %v1525_v12 = vld [vmem:[%s519_s24] sm:$0xff]  ;;  %v558_v15 = vperm.slane %v1533_v14, 0  ;;  %s1377_s20 = smov 80   ;;  %583 = vmatpush.bf16.msra.mxu1 %v555_v22  ;;  %v553_v25 = vpack.c.bf16 %v542_v24, %v540_v23  ;;  %v538_v27 = vld [vmem:[%s1690_s2 + $0x38] sm:$0xff]  ;;  %v532_v29 = vld [vmem:[%s1690_s2 + $0x8] sm:$0xff]  ;;  %s523_s17 = scalar_lea.vmem %s1689_s1, %s1513_s19  ;;  %v559_v54 = vperm.slane %v1533_v14, 1 }
  0x18   : > { %v547_v13 = vpack.c.bf16 %v1525_v12, %v1525_v12  ;;  %v551_v28 = vpack.c.bf16 %v538_v27, %v536_v26  ;;  %v534_v30 = vld [vmem:[%s1690_s2 + $0x18] sm:$0xff]  ;;  %v592_v32 = vld [vmem:[%s1692_s4] sm:$0xff]  ;;  %v593_v33 = vld [vmem:[%s1692_s4 + $0x8] sm:$0xff]  ;;  %s1378_s21 = smov 48  }
  0x19   : > { %571 = vmatpush.bf16.msra.mxu0 %v552_v5  ;;  %v549_v31 = vpack.c.bf16 %v534_v30, %v532_v29  ;;  %v661_v34 = vpack.c.bf16 %v593_v33, %v592_v32  ;;  %v1586_v42 = vld [vmem:[%s523_s17] sm:$0xff]  ;;  %s527_s17 = scalar_lea.vmem %s1702_s14, %s1513_s19 }
  0x1b   : > { %584 = vmatpush.bf16.msra.mxu1 %v553_v25 }
  0x1d   : > { %572 = vmatpush.bf16.msra.mxu0 %v550_v8 }
  0x1f   : > { %585 = vmatpush.bf16.msra.mxu1 %v551_v28 }
  0x21   : > { %573 = vmatpush.bf16.msra.mxu0 %v548_v11 }
  0x23   : > { %586 = vmatpush.bf16.msra.mxu1 %v549_v31 }
  0x24   : > { %1165 = vmatmul.msk.bf16.vlgmr.msra.gmra.mxu0 %vm562_vm0, %v547_v13 }
  0x26   : > { %1166 = vmatmul.msk.bf16.vlgmr.msra.gmra.mxu1 %vm562_vm0, %v547_v13 }
  0x27   : > { %749 = vmatpush.bf16.msrb.mxu1 %v661_v34 }
  0xa1   : > { %v575_v16 = vpop.f32.mrf.mxu0 }
  0xa2   : > { %v576_v17 = vadd.f32 %v575_v16, %v558_v15 }
  0xa3   : > { %v588_v50 = vpop.f32.mrf.mxu1 }
  0xa4   : > { %v1536_v18 = vpack.c.bf16 %v576_v17, %v576_v17  ;;  %v589_v55 = vadd.f32 %v588_v50, %v559_v54  ;;  %v596_v54 = vld [vmem:[%s1692_s4 + $0x20] sm:$0xff] }
  0xa6   : > { %662 = vrot.lane.b32.xlu2 %v1536_v18, %s1372_s26  ;;  %602 = vrot.lane.b32.xlu0 %v1536_v18, %s1373_s27  ;;  %v1593_v56 = vpack.c.bf16 %v589_v55, %v589_v55  ;;  %v597_v55 = vld [vmem:[%s1692_s4 + $0x28] sm:$0xff] }
  0xa8   : > { %v645_v57 = vsel %vm643_vm3, %v1593_v56, 0 }
  0xa9   : > { %v577_v19 = vpop.f32.mrf.mxu0  ;;  %654 = vmatpush.bf16.msra.mxu3 %v645_v57  ;;  %v814_v57 = vpack.c.bf16 %v597_v55, %v596_v54 }
  0xab   : > { %v590_v53 = vpop.f32.mrf.mxu1 }
  0xae   : > { %757 = vrot.lane.b32.xlu2 %v1536_v18, %s1374_s28 }
  0xb6   : > { %834 = vrot.lane.b32.xlu2 %v1536_v18, %s1375_s15 }
  0xbe   : > { %755 = vrot.lane.b32.xlu2 %v1536_v18, %s1376_s16 }
  0xc6   : > { %832 = vrot.lane.b32.xlu2 %v1536_v18, %s1377_s20 }
 0x100   : > { %v663_v35 = vpop.permute.xlu2 %662 }
 0x108   : > { %v758_v36 = vpop.permute.xlu2 %757 }
 0x109   : > { %v763_v0 = vsel %vm604_vm1, %v758_v36, 0 }
 0x110   : > { %v835_v37 = vpop.permute.xlu2 %834 }
 0x111   : > { %v840_v38 = vsel %vm604_vm1, %v835_v37, 0 }
 0x112   : > { %849 = vmatpush.bf16.xpose.msra.mxu1 %v840_v38 }
 0x118   : > { %v603_v39 = vpop.permute.xlu0 %602  ;;  %v756_v1 = vpop.permute.xlu2 %755 }
 0x119   : > { %v609_v40 = vsel %vm604_vm1, %v603_v39, 0 }
 0x11a   : > { %618 = vmatpush.bf16.xpose.msra.mxu2 %v609_v40 }
 0x120   : > { %v833_v5 = vpop.permute.xlu2 %832 }
 0x121   : > { %1167 = vmatmul.msk.bf16.vlgmr.msra.gmra.mxu2 %vm604_vm1, %v1536_v18 }
 0x1a4   : > { %v620_v41 = vpop.f32.mrf.mxu2 }
 0x1a5   : > { %v624_v43 = vmul.f32 0.25, %v620_v41 }
 0x1a7   : > { %v625_v44 = vadd.f32 %v624_v43, %v1586_v42 }
 0x1a9   : > { %v627_v45 = vsel %vm626_vm2, %v625_v44, -inf }
 0x1aa   : > { %628 = vmax.xlane.f32.xlu0 %v627_v45 }
 0x1ac   : > { %v622_v46 = vpop.f32.mrf.mxu2 }
 0x21d   : > { %v629_v47 = vpop.xlane.xlu0 %628 }
 0x21e   : > { %v630_v48 = vsub.f32 %v625_v44, %v629_v47 }
 0x220   : > { %v631_v49 = vmul.f32 1.442695, %v630_v48 }
 0x222   : > { %1239 = vpow2.f32 %v631_v49 }
 0x228   : > { %v1240_v51 = vpop.eup %1239 }
 0x229   : > { %v633_v52 = vsel %vm626_vm2, %v1240_v51, 0.0 }
 0x22a   : > { %634 = vadd.xlane.f32.xlu1 %v633_v52  ;;  %v595_v52 = vld [vmem:[%s1692_s4 + $0x18] sm:$0xff] }
 0x243   : > { %664 = vrot.lane.b32.xlu1 %v1536_v18, %s1378_s21 }
 0x29d   : > { %v635_v58 = vpop.xlane.xlu1 %634 }
 0x29e   : > { %1241 = vrcp.f32 %v635_v58 }
 0x2a4   : > { %v1242_v59 = vpop.eup %1241 }
 0x2a5   : > { %v637_v60 = vmul.f32 %v1242_v59, %v1240_v51  ;;  %v594_v51 = vld [vmem:[%s1692_s4 + $0x10] sm:$0xff] }
 0x2a6   : > { %v722_v53 = vpack.c.bf16 %v595_v52, %v594_v51 }
 0x2a7   : > { %v638_v61 = vpack.c.bf16 %v637_v60, %v637_v60 }
 0x2a8   : > { %733 = vmatpush.bf16.msrb.mxu0 %v722_v53  ;;  %v993_v53 = vld [vmem:[#allocation4 + $0x28] sm:$0xff] }
 0x2a9   : > { %1168 = vmatmul.msk.bf16.vlgmr.msra.gmra.mxu3 %vm626_vm2, %v638_v61 }
 0x2ac   : > { %825 = vmatpush.bf16.msra.mxu0 %v814_v57 }
 0x2b5   : > { %v665_v62 = vpop.permute.xlu1 %664 }
 0x2b6   : > { %v670_v63 = vsel %vm604_vm1, %v665_v62, 0 }
 0x2b7   : > { %679 = vmatpush.bf16.xpose.msrb.mxu3 %v670_v63 }
 0x2be   : > { %1169 = vmatmul.msk.bf16.vlgmr.msrb.gmra.mxu3 %vm604_vm1, %v663_v35 }
 0x2bf   : > { %772 = vmatpush.bf16.xpose.msra.mxu3 %v763_v0 }
 0x2ce   : > { %1173 = vmatmul.msk.bf16.vlgmr.msra.gmra.mxu3 %vm604_vm1, %v756_v1 }
 0x32c   : > { %v656_v2 = vpop.f32.mrf.mxu3 }
 0x32d   : > { %v660_v3 = vpack.c.bf16 %v656_v2, %v656_v2 }
 0x32f   : > { %1172 = vmatmul.msk.bf16.vlgmr.msrb.gmra.mxu1 %vm604_vm1, %v660_v3 }
 0x334   : > { %v658_v4 = vpop.f32.mrf.mxu3 }
 0x33f   : > { %1176 = vmatmul.msk.bf16.vlgmr.msra.gmra.mxu1 %vm604_vm1, %v833_v5  ;;  %v598_v5 = vld [vmem:[%s1692_s4 + $0x30] sm:$0xff] }
 0x341   : > { %v681_v6 = vpop.f32.mrf.mxu3 }
 0x342   : > { %v685_v7 = vmul.f32 0.25, %v681_v6  ;;  %v599_v6 = vld [vmem:[%s1692_s4 + $0x38] sm:$0xff] }
 0x344   : > { %v686_v8 = vadd.f32 %v685_v7, %v1586_v42  ;;  %v891_v7 = vpack.c.bf16 %v599_v6, %v598_v5  ;;  %v990_v6 = vld [vmem:[#allocation4 + $0x10] sm:$0xff] }
 0x346   : > { %v687_v9 = vsel %vm626_vm2, %v686_v8, -inf }
 0x347   : > { %688 = vmax.xlane.f32.xlu1 %v687_v9 }
 0x349   : > { %v683_v10 = vpop.f32.mrf.mxu3 }
 0x351   : > { %v774_v11 = vpop.f32.mrf.mxu3 }
 0x352   : > { %v778_v13 = vmul.f32 0.25, %v774_v11 }
 0x354   : > { %v779_v14 = vadd.f32 %v778_v13, %v1586_v42 }
 0x356   : > { %v780_v15 = vsel %vm626_vm2, %v779_v14, -inf }
 0x357   : > { %781 = vmax.xlane.f32.xlu0 %v780_v15 }
 0x359   : > { %v776_v16 = vpop.f32.mrf.mxu3 }
 0x36b   : > { %700 = vrot.lane.b32.xlu0 %v1593_v56, %s1372_s26 }
 0x3ac   : > { %v1610_v17 = vpop.f32.mrf.mxu1 }
 0x3b4   : > { %v753_v18 = vpop.f32.mrf.mxu1 }
 0x3ba   : > { %v689_v19 = vpop.xlane.xlu1 %688 }
 0x3bb   : > { %v690_v20 = vsub.f32 %v686_v8, %v689_v19  ;;  %v1232_v19 = vld [vmem:[%s1693_s5] ss:$0 sm:$0xff] }
 0x3bc   : > { %v851_v21 = vpop.f32.mrf.mxu1 }
 0x3bd   : > { %v691_v22 = vmul.f32 1.442695, %v690_v20  ;;  %v855_v23 = vmul.f32 0.25, %v851_v21 }
 0x3bf   : > { %1243 = vpow2.f32 %v691_v22  ;;  %v856_v24 = vadd.f32 %v855_v23, %v1586_v42 }
 0x3c1   : > { %v857_v25 = vsel %vm626_vm2, %v856_v24, -inf }
 0x3c2   : > { %858 = vmax.xlane.f32.xlu2 %v857_v25 }
 0x3c4   : > { %v853_v26 = vpop.f32.mrf.mxu1 }
 0x3c5   : > { %v1244_v27 = vpop.eup %1243 }
 0x3c6   : > { %v693_v28 = vsel %vm626_vm2, %v1244_v27, 0.0 }
 0x3c7   : > { %694 = vadd.xlane.f32.xlu0 %v693_v28 }
 0x3ca   : > { %v782_v29 = vpop.xlane.xlu0 %781 }
 0x3cb   : > { %v783_v30 = vsub.f32 %v779_v14, %v782_v29 }
 0x3cd   : > { %v784_v31 = vmul.f32 1.442695, %v783_v30 }
 0x3cf   : > { %1245 = vpow2.f32 %v784_v31 }
 0x3d5   : > { %v1246_v32 = vpop.eup %1245 }
 0x3d6   : > { %v786_v33 = vsel %vm626_vm2, %v1246_v32, 0.0 }
 0x3d7   : > { %787 = vadd.xlane.f32.xlu2 %v786_v33 }
 0x3db   : > { %792 = vrot.lane.b32.xlu0 %v1593_v56, %s1376_s16 }
 0x3dd   : > { %v701_v34 = vpop.permute.xlu0 %700 }
 0x3de   : > { %v706_v35 = vsel %vm643_vm3, %v701_v34, 0 }
 0x3df   : > { %715 = vmatpush.bf16.msrb.mxu2 %v706_v35 }
 0x435   : > { %v859_v36 = vpop.xlane.xlu2 %858 }
 0x436   : > { %v860_v37 = vsub.f32 %v856_v24, %v859_v36  ;;  %v960_v36 = vld [vmem:[#allocation2 + $0x30] sm:$0xff] }
 0x438   : > { %v861_v38 = vmul.f32 1.442695, %v860_v37  ;;  %v961_v37 = vld [vmem:[#allocation2 + $0x38] sm:$0xff] }
 0x43a   : > { %1247 = vpow2.f32 %v861_v38  ;;  %v695_v39 = vpop.xlane.xlu0 %694  ;;  %v966_v38 = vpack.c.bf16 %v961_v37, %v960_v36 }
 0x43b   : > { %1249 = vrcp.f32 %v695_v39  ;;  %v958_v39 = vld [vmem:[#allocation2 + $0x20] sm:$0xff] }
 0x440   : > { %v1248_v40 = vpop.eup %1247 }
 0x441   : > { %v1250_v41 = vpop.eup %1249  ;;  %v863_v42 = vsel %vm626_vm2, %v1248_v40, 0.0 }
 0x442   : > { %v697_v43 = vmul.f32 %v1250_v41, %v1244_v27  ;;  %864 = vadd.xlane.f32.xlu1 %v863_v42  ;;  %v956_v42 = vld [vmem:[#allocation2 + $0x10] sm:$0xff] }
 0x444   : > { %v698_v44 = vpack.c.bf16 %v697_v43, %v697_v43  ;;  %v957_v43 = vld [vmem:[#allocation2 + $0x18] sm:$0xff] }
 0x446   : > { %1170 = vmatmul.msk.bf16.vlgmr.msrb.gmra.mxu2 %vm626_vm2, %v698_v44  ;;  %v964_v44 = vpack.c.bf16 %v957_v43, %v956_v42 }
 0x44a   : > { %v788_v45 = vpop.xlane.xlu2 %787 }
 0x44b   : > { %1251 = vrcp.f32 %v788_v45  ;;  %v954_v45 = vld [vmem:[#allocation2] sm:$0xff] }
 0x44d   : > { %v793_v46 = vpop.permute.xlu0 %792 }
 0x44e   : > { %v798_v47 = vsel %vm643_vm3, %v793_v46, 0  ;;  %v955_v46 = vld [vmem:[#allocation2 + $0x8] sm:$0xff] }
 0x44f   : > { %807 = vmatpush.bf16.msra.mxu2 %v798_v47  ;;  %v963_v47 = vpack.c.bf16 %v955_v46, %v954_v45 }
 0x451   : > { %v1252_v48 = vpop.eup %1251 }
 0x452   : > { %v790_v49 = vmul.f32 %v1252_v48, %v1246_v32  ;;  %v994_v48 = vld [vmem:[#allocation4 + $0x30] sm:$0xff] }
 0x453   : > { %902 = vmatpush.bf16.msrb.mxu2 %v891_v7  ;;  %v991_v7 = vld [vmem:[#allocation4 + $0x18] sm:$0xff] }
 0x454   : > { %v791_v50 = vpack.c.bf16 %v790_v49, %v790_v49  ;;  %v995_v49 = vld [vmem:[#allocation4 + $0x38] sm:$0xff] }
 0x455   : > { %v1000_v52 = vpack.c.bf16 %v995_v49, %v994_v48 }
 0x456   : > { %1174 = vmatmul.msk.bf16.vlgmr.msra.gmra.mxu2 %vm626_vm2, %v791_v50  ;;  %v992_v50 = vld [vmem:[#allocation4 + $0x20] sm:$0xff] }
 0x457   : > { %1012 = vmatpush.bf16.msrb.mxu1 %v1000_v52  ;;  %v999_v55 = vpack.c.bf16 %v993_v53, %v992_v50 }
 0x45b   : > { %869 = vrot.lane.b32.xlu1 %v1593_v56, %s1377_s20  ;;  %1013 = vmatpush.bf16.msrb.mxu1 %v999_v55 }
 0x4b5   : > { %v865_v56 = vpop.xlane.xlu1 %864 }
 0x4b6   : > { %1253 = vrcp.f32 %v865_v56 }
 0x4bc   : > { %v1254_v58 = vpop.eup %1253 }
 0x4bd   : > { %v867_v61 = vmul.f32 %v1254_v58, %v1248_v40  ;;  %v959_v40 = vld [vmem:[#allocation2 + $0x28] sm:$0xff] }
 0x4be   : > { %v965_v41 = vpack.c.bf16 %v959_v40, %v958_v39  ;;  %v1237_v39 = vld [vmem:[%s1700_s12] ss:$0 sm:$0xff] }
 0x4bf   : > { %v868_v0 = vpack.c.bf16 %v867_v61, %v867_v61 }
 0x4c9   : > { %v717_v59 = vpop.f32.mrf.mxu2 }
 0x4ca   : > { %v721_v60 = vpack.c.bf16 %v717_v59, %v717_v59 }
 0x4cc   : > { %1171 = vmatmul.msk.bf16.vlgmr.msrb.gmra.mxu0 %vm604_vm1, %v721_v60 }
 0x4cd   : > { %v870_v62 = vpop.permute.xlu1 %869  ;;  %978 = vmatpush.bf16.msrb.mxu0 %v966_v38 }
 0x4ce   : > { %v875_v63 = vsel %vm643_vm3, %v870_v62, 0 }
 0x4cf   : > { %884 = vmatpush.bf16.msrb.mxu3 %v875_v63  ;;  %v1233_v63 = vld [vmem:[%s1698_s10] ss:$0 sm:$0xff] }
 0x4d1   : > { %v719_v1 = vpop.f32.mrf.mxu2  ;;  %979 = vmatpush.bf16.msrb.mxu0 %v965_v41 }
 0x4d2   : > { %1177 = vmatmul.msk.bf16.vlgmr.msrb.gmra.mxu3 %vm626_vm2, %v868_v0  ;;  %v1234_v1 = vld [vmem:[%s1699_s11] ss:$0 sm:$0xff] }
 0x4d5   : > { %980 = vmatpush.bf16.msrb.mxu0 %v964_v44 }
 0x4d9   : > { %v809_v2 = vpop.f32.mrf.mxu2  ;;  %981 = vmatpush.bf16.msrb.mxu0 %v963_v47 }
 0x4da   : > { %v813_v3 = vpack.c.bf16 %v809_v2, %v809_v2 }
 0x4dc   : > { %1175 = vmatmul.msk.bf16.vlgmr.msra.gmra.mxu0 %vm604_vm1, %v813_v3 }
 0x4e1   : > { %v811_v4 = vpop.f32.mrf.mxu2 }
 0x549   : > { %v735_v8 = vpop.f32.mrf.mxu0 }
 0x54a   : > { %v752_v13 = vadd.f32 %v1610_v17, %v735_v8  ;;  %v1379_v17 = vmov 64.0   ;;  %v998_v8 = vpack.c.bf16 %v991_v7, %v990_v6 }
 0x54b   : > { %1255 = vrcp.f32 %v1379_v17 }
 0x54c   : > { %1014 = vmatpush.bf16.msrb.mxu1 %v998_v8 }
 0x551   : > { %v737_v9 = vpop.f32.mrf.mxu0  ;;  %v1256_v26 = vpop.eup %1255 }
 0x552   : > { %v921_v27 = vmul.f32 64.0, %v1256_v26  ;;  %vm925_vm4 = vweird.f32 %v1256_v26  ;;  %v988_v9 = vld [vmem:[#allocation4] sm:$0xff] }
 0x554   : > { %v922_v28 = vsub.f32 1.0, %v921_v27 }
 0x555   : > { %v886_v10 = vpop.f32.mrf.mxu3 }
 0x556   : > { %v890_v11 = vpack.c.bf16 %v886_v10, %v886_v10  ;;  %v923_v29 = vmul.f32 %v1256_v26, %v922_v28  ;;  %v989_v10 = vld [vmem:[#allocation4 + $0x8] sm:$0xff] }
 0x558   : > { %1178 = vmatmul.msk.bf16.vlgmr.msrb.gmra.mxu2 %vm604_vm1, %v890_v11  ;;  %v924_v30 = vadd.f32 %v1256_v26, %v923_v29  ;;  %v997_v11 = vpack.c.bf16 %v989_v10, %v988_v9 }
 0x559   : > { %v827_v14 = vpop.f32.mrf.mxu0 }
 0x55a   : > { %v831_v15 = vadd.f32 %v827_v14, %v752_v13  ;;  %v1654_v31 = vsel %vm925_vm4, %v1256_v26, %v924_v30  ;;  %1015 = vmatpush.bf16.msrb.mxu1 %v997_v11  ;;  %v1235_v13 = vld [vmem:[%s1695_s7] ss:$0 sm:$0xff] }
 0x55d   : > { %v888_v16 = vpop.f32.mrf.mxu3 }
 0x561   : > { %v829_v18 = vpop.f32.mrf.mxu0 }
 0x5db   : > { %v904_v20 = vpop.f32.mrf.mxu2 }
 0x5dc   : > { %v908_v21 = vadd.f32 %v904_v20, %v831_v15  ;;  %v1236_v20 = vld [vmem:[#allocation6] ss:$0 sm:$0xff] }
 0x5de   : > { %v913_v22 = vadd.f32 %v1232_v19, %v908_v21 }
 0x5e0   : > { %v914_v23 = vadd.f32 %v913_v22, %v1525_v12 }
 0x5e2   : > { %v917_v24 = vsel %vm562_vm0, %v914_v23, 0.0 }
 0x5e3   : > { %918 = vadd.xlane.f32.xlu2 %v917_v24  ;;  %v906_v25 = vpop.f32.mrf.mxu2 }
 0x656   : > { %v919_v32 = vpop.xlane.xlu2 %918 }
 0x657   : > { %v927_v33 = vmul.f32 %v1654_v31, %v919_v32 }
 0x659   : > { %v928_v34 = vsub.f32 %v914_v23, %v927_v33 }
 0x65b   : > { %v929_v35 = vmul.f32 %v928_v34, %v928_v34 }
 0x65d   : > { %v930_v12 = vsel %vm562_vm0, %v929_v35, 0.0 }
 0x65e   : > { %931 = vadd.xlane.f32.xlu0 %v930_v12 }
 0x6d1   : > { %v932_v51 = vpop.xlane.xlu0 %931 }
 0x6d2   : > { %v933_v54 = vmul.f32 %v932_v51, %v1654_v31 }
 0x6d4   : > { %v934_v57 = vadd.f32 1e-05, %v933_v54 }
 0x6d6   : > { %1257 = vrsqrt.f32 %v934_v57  ;;  %vm941_vm6 = vweird.f32 %v934_v57 }
 0x6dc   : > { %v1258_v56 = vpop.eup %1257 }
 0x6dd   : > { %v936_v58 = vmul.f32 %v1258_v56, %v934_v57  ;;  %vm942_vm5 = vweird.f32 %v1258_v56 }
 0x6de   : > { %vm943_vm7 = vmor %vm941_vm6, %vm942_vm5 }
 0x6df   : > { %v937_v59 = vmul.f32 %v1258_v56, %v936_v58 }
 0x6e1   : > { %v938_v60 = vmul.f32 0.5, %v937_v59 }
 0x6e3   : > { %v939_v61 = vsub.f32 1.5, %v938_v60 }
 0x6e5   : > { %v940_v62 = vmul.f32 %v1258_v56, %v939_v61 }
 0x6e7   : > { %v944_v0 = vsel %vm943_vm7, %v1258_v56, %v940_v62 }
 0x6e8   : > { %v945_v2 = vmul.f32 %v944_v0, %v928_v34 }
 0x6ea   : > { %v949_v3 = vmul.f32 %v1233_v63, %v945_v2 }
 0x6ec   : > { %v953_v4 = vadd.f32 %v1234_v1, %v949_v3 }
 0x6ee   : > { %v962_v5 = vpack.c.bf16 %v953_v4, %v953_v4 }
 0x6f0   : > { %1179 = vmatmul.msk.bf16.vlgmr.msrb.gmra.mxu0 %vm562_vm0, %v962_v5 }
 0x76d   : > { %v983_v14 = vpop.f32.mrf.mxu0 }
 0x76e   : > { %v984_v15 = vadd.f32 %v1235_v13, %v983_v14 }
 0x770   : > { %v987_v16 = vmax.f32 %v984_v15, 0.0 }
 0x772   : > { %v996_v18 = vpack.c.bf16 %v987_v16, %v987_v16 }
 0x774   : > { %1180 = vmatmul.msk.bf16.vlgmr.msrb.gmra.mxu1 %vm562_vm0, %v996_v18 }
 0x775   : > { %v985_v19 = vpop.f32.mrf.mxu0 }
 0x7f1   : > { %v1017_v21 = vpop.f32.mrf.mxu1 }
 0x7f2   : > { %v1018_v22 = vadd.f32 %v1236_v20, %v1017_v21 }
 0x7f4   : > { %v1021_v23 = vadd.f32 %v1018_v22, %v953_v4 }
 0x7f6   : > { %v1024_v24 = vsel %vm562_vm0, %v1021_v23, 0.0 }
 0x7f7   : > { %1025 = vadd.xlane.f32.xlu2 %v1024_v24 }
 0x7f9   : > { %v1019_v25 = vpop.f32.mrf.mxu1 }
 0x86a   : > { %v1026_v17 = vpop.xlane.xlu2 %1025 }
 0x86b   : > { %v1027_v26 = vmul.f32 %v1026_v17, %v1654_v31 }
 0x86d   : > { %v1028_v27 = vsub.f32 %v1021_v23, %v1027_v26 }
 0x86f   : > { %v1029_v28 = vmul.f32 %v1028_v27, %v1028_v27 }
 0x871   : > { %v1030_v29 = vsel %vm562_vm0, %v1029_v28, 0.0 }
 0x872   : > { %1031 = vadd.xlane.f32.xlu2 %v1030_v29 }
 0x8e5   : > { %v1032_v30 = vpop.xlane.xlu2 %1031 }
 0x8e6   : > { %v1033_v32 = vmul.f32 %v1032_v30, %v1654_v31  ;;  %v1238_v31 = vld [vmem:[%s1701_s13] ss:$0 sm:$0xff] }
 0x8e8   : > { %v1034_v33 = vadd.f32 1e-05, %v1033_v32 }
 0x8ea   : > { %1259 = vrsqrt.f32 %v1034_v33  ;;  %vm1041_vm9 = vweird.f32 %v1034_v33 }
 0x8f0   : > { %v1260_v34 = vpop.eup %1259 }
 0x8f1   : > { %v1036_v35 = vmul.f32 %v1260_v34, %v1034_v33  ;;  %vm1042_vm8 = vweird.f32 %v1260_v34 }
 0x8f2   : > { %vm1043_vm10 = vmor %vm1041_vm9, %vm1042_vm8 }
 0x8f3   : > { %v1037_v12 = vmul.f32 %v1260_v34, %v1036_v35 }
 0x8f5   : > { %v1038_v36 = vmul.f32 0.5, %v1037_v12 }
 0x8f7   : > { %v1039_v37 = vsub.f32 1.5, %v1038_v36 }
 0x8f9   : > { %v1040_v38 = vmul.f32 %v1260_v34, %v1039_v37 }
 0x8fb   : > { %v1044_v40 = vsel %vm1043_vm10, %v1260_v34, %v1040_v38 }
 0x8fc   : > { %v1045_v41 = vmul.f32 %v1044_v40, %v1028_v27 }
 0x8fe   : > { %v1049_v42 = vmul.f32 %v1237_v39, %v1045_v41 }
 0x900   : > { %v1053_v43 = vadd.f32 %v1238_v31, %v1049_v42 }
 0x902   : > { %1054 = vst.msk [vmem:[%s527_s17] sm:$0xff] %vm562_vm0, %v1053_v43 }
 0x903 PF: > { %s26_s29 = sadd.s32 1, %s1365_s29  }
 0x904   : > { %p23_p7 = scmp.ge.s32.totalorder %s26_s29, 4  }
 0x906   :  { %25 = sbr.rel (!%p23_p7) target bundleno = 2 (0x2), region = 122 }
 0x90b   :  { %1074 = vsyncpa [#allocation3], 1 }
 0x90c   :  { %1076 = vsyncpa [#allocation3 + $0x1], 1 }
 0x90d   :  { %1077 = vsyncpa [#allocation5], 1 }

// kernel: forward.6
= control target key start
LH: loop header
LB: loop body
LE: loop exit
PB: predicated region body
PF: predicated region fallthrough
CT: control target
= control target key end

     0   :  { %s1718_s0 = inlined_call_operand.vmem [shape: f32[2,8,64], index: 0, kind: input, shape index: {}]   ;;  %s1719_s1 = inlined_call_operand.vmem [shape: f32[2,8,8], index: 1, kind: input, shape index: {}]   ;;  %s1720_s2 = inlined_call_operand.hbm [shape: f32[64,192], index: 2, kind: input, shape index: {}]   ;;  %s1721_s3 = inlined_call_operand.vmem [shape: f32[1,192], index: 3, kind: input, shape index: {}]   ;;  %s1722_s4 = inlined_call_operand.hbm [shape: f32[64,64], index: 4, kind: input, shape index: {}]   ;;  %s1723_s5 = inlined_call_operand.vmem [shape: f32[1,64], index: 5, kind: input, shape index: {}]   ;;  %s1724_s6 = inlined_call_operand.hbm [shape: f32[64,64], index: 6, kind: input, shape index: {}]   ;;  %s1725_s7 = inlined_call_operand.vmem [shape: f32[1,64], index: 7, kind: input, shape index: {}]   ;;  %s1726_s8 = inlined_call_operand.hbm [shape: f32[64,64], index: 8, kind: input, shape index: {}]   ;;  %s1727_s9 = inlined_call_operand.vmem [shape: f32[1,64], index: 9, kind: input, shape index: {}]   ;;  %s1728_s10 = inlined_call_operand.vmem [shape: f32[1,64], index: 10, kind: input, shape index: {}]   ;;  %s1729_s11 = inlined_call_operand.vmem [shape: f32[1,64], index: 11, kind: input, shape index: {}]   ;;  %s1730_s12 = inlined_call_operand.vmem [shape: f32[1,64], index: 12, kind: input, shape index: {}]   ;;  %s1731_s13 = inlined_call_operand.vmem [shape: f32[1,64], index: 13, kind: input, shape index: {}]   ;;  %s1732_s14 = inlined_call_operand.vmem [shape: f32[2,8,64], index: 14, kind: output, shape index: {}]  }
   0x1   :  { %1734 = sst [smem:[#allocation13_spill]] %s1720_s2 }
   0x2   :  { %1735 = sst [smem:[#allocation14_spill]] %s1722_s4 }
   0x3   :  { %1736 = sst [smem:[#allocation15_spill]] %s1732_s14 }
   0x4   :  { %19 = vsyncpa [#allocation3], 0 }
   0x5   :  { %20 = vsyncpa [#allocation5], 0 }
   0x6   :  { %21 = vsyncpa [#allocation8], 0  ;;  %s1535_s29 = smov 0  }
   0x7 LB: > { %1737 = sst [smem:[#allocation12_spill]] %s1442_s29  ;;  %s1544_s17 = sadd.s32 4294967295, %s1442_s29   ;;  %s1442_s29 = sphi %s1535_s29, %s27_s29  }
   0x8   : > { %s1738_s4 = sld [smem:[#allocation14_spill]]  ;;  %p1182_p0 = scmp.ge.s32.totalorder %s1442_s29, 1 }
   0x9   : > { %p362_p1 = scmp.lt.s32.totalorder %s1442_s29, 3  ;;  %p1243_p2 = scmp.eq.s32.totalorder %s1544_s17, 0 }
   0xa   : > { %s1444_s19 = smov [#allocation4]   ;;  %s1740_s2 = sld [smem:[#allocation13_spill]] }
   0xb   : > { %p1549_p3 = pnand %p1182_p0, %p362_p1  ;;  %s392_s20 = sshll.u32 %s1444_s19, 4  ;;  %s393_s20 = int_to_ptr.vmem [resolvable:$true] %s392_s20 }
   0xc   : > { %s1445_s25 = smov [#allocation2]   ;;  %s1446_s27 = smov 128  }
   0xd   : > { %p1230_p4 = pneg %p1549_p3  ;;  %s375_s26 = sshll.u32 %s1445_s25, 4  ;;  %s376_s26 = int_to_ptr.vmem [resolvable:$true] %s375_s26 }
   0xe   : > { %s390_s16 = sshll.u32 %s1738_s4, 4  ;;  %s1447_s28 = smov 8   ;;  %s391_s16 = int_to_ptr.hbm [resolvable:$true] %s390_s16 }
   0xf   : > { %p1560_p5 = pnand %p1243_p2, %p1230_p4  ;;  %s407_s19 = sshll.u32 %s1724_s6, 4  ;;  %s408_s19 = int_to_ptr.hbm [resolvable:$true] %s407_s19 }
  0x10   : > { %s373_s23 = sshll.u32 %s1740_s2, 4  ;;  %s1448_s21 = smov 256   ;;  %s374_s23 = int_to_ptr.hbm [resolvable:$true] %s373_s23 }
  0x11   : > { %1236 = dma.hbm_to_vmem [thread:$0]  (!%p1560_p5), %s391_s16, 1024, %s393_s20, [#allocation5], %s1446_s27, %s1446_s27, %s1447_s28  }
  0x12   : > { %s1449_s22 = smov 16   ;;  %s1450_s2 = smov [#allocation6]  }
  0x13   : > { %1233 = dma.hbm_to_vmem [thread:$0]  (!%p1560_p5), %s374_s23, 2048, %s376_s26, [#allocation3], %s1448_s21, %s1448_s21, %s1449_s22  }
  0x14   : > { %s409_s4 = sshll.u32 %s1450_s2, 4  ;;  %s424_s25 = sshll.u32 %s1726_s8, 4  ;;  %s410_s4 = int_to_ptr.vmem [resolvable:$true] %s409_s4  ;;  %s425_s25 = int_to_ptr.hbm [resolvable:$true] %s424_s25 }
  0x15   : > { %1239 = dma.hbm_to_vmem [thread:$0]  (!%p1560_p5), %s408_s19, 1024, %s410_s4, [#allocation5], %s1446_s27, %s1446_s27, %s1447_s28  }
  0x16   : > { %s1451_s16 = smov [#allocation7]   ;;  %471 = sbr.rel (%p1549_p3) target bundleno = 2321 (0x911), region = 76 }
  0x17   : > { %s426_s20 = sshll.u32 %s1451_s16, 4  ;;  %s427_s20 = int_to_ptr.vmem [resolvable:$true] %s426_s20 }
  0x18   : > { %1242 = dma.hbm_to_vmem [thread:$0]  (!%p1560_p5), %s425_s25, 1024, %s427_s20, [#allocation8], %s1446_s27, %s1446_s27, %s1447_s28  }
  0x1b   : > { %1429 = dma.done.wait (%p1243_p2), [#allocation3], 2048  }
  0x1c   : > { %1431 = vsyncadd (%p1243_p2), [#allocation3], 4294965248 }
  0x1d   : > { %1433 = dma.done.wait (%p1243_p2), [#allocation5], 2048  }
  0x1e   : > { %1435 = vsyncadd (%p1243_p2), [#allocation5], 4294965248 }
  0x1f   : > { %1437 = dma.done.wait (%p1243_p2), [#allocation8], 1024  }
  0x20   : > { %1439 = vsyncadd (%p1243_p2), [#allocation8], 4294966272  ;;  %p535_p6 = scmp.lt.s32.totalorder %s1544_s17, 1  ;;  %v562_v0 = vld [vmem:[#allocation2 + $0x60] sm:$0xff]  ;;  %v564_v1 = vld [vmem:[#allocation2 + $0x70] sm:$0xff]  ;;  %vm581_vm0 = vcmask 523264  }
  0x21   : > { %v558_v2 = vld [vmem:[#allocation2 + $0x40] sm:$0xff]  ;;  %v573_v3 = vpack.c.bf16 %v564_v1, %v562_v0  ;;  %v560_v4 = vld [vmem:[#allocation2 + $0x50] sm:$0xff]  ;;  %s1452_s23 = smov 112   ;;  %s1453_s24 = smov 64   ;;  %v563_v20 = vld [vmem:[#allocation2 + $0x68] sm:$0xff]  ;;  %vm623_vm1 = vcmask 130048  }
  0x22   : > { %s1745_s17 = smov (!%p535_p6, %s1544_s17), 1  ;;  %v571_v5 = vpack.c.bf16 %v560_v4, %v558_v2  ;;  %v554_v6 = vld [vmem:[#allocation2 + $0x20] sm:$0xff]  ;;  %v556_v7 = vld [vmem:[#allocation2 + $0x30] sm:$0xff]  ;;  %s1454_s26 = smov 32   ;;  %v565_v21 = vld [vmem:[#allocation2 + $0x78] sm:$0xff]  ;;  %vm645_vm2 = vcmask 64512  }
  0x23   : > { %589 = vmatpush.bf16.msra.mxu0 %v573_v3  ;;  %s1594_s2 = sshll.u32 %s1745_s17, 3  ;;  %v569_v8 = vpack.c.bf16 %v556_v7, %v554_v6  ;;  %v550_v9 = vld [vmem:[#allocation2] sm:$0xff]  ;;  %v552_v10 = vld [vmem:[#allocation2 + $0x10] sm:$0xff]  ;;  %s1455_s27 = smov 16   ;;  %v574_v22 = vpack.c.bf16 %v565_v21, %v563_v20  ;;  %v559_v23 = vld [vmem:[#allocation2 + $0x48] sm:$0xff]  ;;  %vm662_vm3 = vcmask 1043456  }
  0x24   : > { %s538_s29 = scalar_lea.vmem %s1718_s0, %s1594_s2  ;;  %v567_v11 = vpack.c.bf16 %v552_v10, %v550_v9  ;;  %v1608_v14 = vld [vmem:[%s1721_s3] sm:$0x3]  ;;  %s1456_s28 = smov 96   ;;  %v561_v24 = vld [vmem:[#allocation2 + $0x58] sm:$0xff]  ;;  %v555_v26 = vld [vmem:[#allocation2 + $0x28] sm:$0xff] }
  0x25   : > { %v1600_v12 = vld [vmem:[%s538_s29] sm:$0xff]  ;;  %v577_v15 = vperm.slane %v1608_v14, 0  ;;  %s1457_s30 = smov 80   ;;  %602 = vmatpush.bf16.msra.mxu1 %v574_v22  ;;  %v572_v25 = vpack.c.bf16 %v561_v24, %v559_v23  ;;  %v557_v27 = vld [vmem:[#allocation2 + $0x38] sm:$0xff]  ;;  %v551_v29 = vld [vmem:[#allocation2 + $0x8] sm:$0xff]  ;;  %s542_s21 = scalar_lea.vmem %s1719_s1, %s1594_s2  ;;  %v578_v54 = vperm.slane %v1608_v14, 1 }
  0x26   : > { %v566_v13 = vpack.c.bf16 %v1600_v12, %v1600_v12  ;;  %v570_v28 = vpack.c.bf16 %v557_v27, %v555_v26  ;;  %v553_v30 = vld [vmem:[#allocation2 + $0x18] sm:$0xff]  ;;  %v611_v32 = vld [vmem:[#allocation4] sm:$0xff]  ;;  %v612_v33 = vld [vmem:[#allocation4 + $0x8] sm:$0xff]  ;;  %s1458_s22 = smov 48  }
  0x27   : > { %590 = vmatpush.bf16.msra.mxu0 %v571_v5  ;;  %v568_v31 = vpack.c.bf16 %v553_v30, %v551_v29  ;;  %v680_v34 = vpack.c.bf16 %v612_v33, %v611_v32  ;;  %v1631_v42 = vld [vmem:[%s542_s21] sm:$0xff]  ;;  %s1742_s21 = sld [smem:[#allocation15_spill]] }
  0x29   : > { %603 = vmatpush.bf16.msra.mxu1 %v572_v25 }
  0x2b   : > { %591 = vmatpush.bf16.msra.mxu0 %v569_v8 }
  0x2d   : > { %604 = vmatpush.bf16.msra.mxu1 %v570_v28 }
  0x2f   : > { %592 = vmatpush.bf16.msra.mxu0 %v567_v11 }
  0x31   : > { %605 = vmatpush.bf16.msra.mxu1 %v568_v31 }
  0x32   : > { %1196 = vmatmul.msk.bf16.vlgmr.msra.gmra.mxu0 %vm581_vm0, %v566_v13 }
  0x34   : > { %1197 = vmatmul.msk.bf16.vlgmr.msra.gmra.mxu1 %vm581_vm0, %v566_v13 }
  0x35   : > { %768 = vmatpush.bf16.msrb.mxu1 %v680_v34 }
  0xaf   : > { %v594_v16 = vpop.f32.mrf.mxu0 }
  0xb0   : > { %v595_v17 = vadd.f32 %v594_v16, %v577_v15 }
  0xb1   : > { %v607_v50 = vpop.f32.mrf.mxu1 }
  0xb2   : > { %v1611_v18 = vpack.c.bf16 %v595_v17, %v595_v17  ;;  %v608_v55 = vadd.f32 %v607_v50, %v578_v54  ;;  %v615_v54 = vld [vmem:[#allocation4 + $0x20] sm:$0xff] }
  0xb4   : > { %681 = vrot.lane.b32.xlu2 %v1611_v18, %s1452_s23  ;;  %621 = vrot.lane.b32.xlu0 %v1611_v18, %s1453_s24  ;;  %v1638_v56 = vpack.c.bf16 %v608_v55, %v608_v55  ;;  %v616_v55 = vld [vmem:[#allocation4 + $0x28] sm:$0xff] }
  0xb6   : > { %v664_v57 = vsel %vm662_vm3, %v1638_v56, 0 }
  0xb7   : > { %v596_v19 = vpop.f32.mrf.mxu0  ;;  %673 = vmatpush.bf16.msra.mxu3 %v664_v57  ;;  %v833_v57 = vpack.c.bf16 %v616_v55, %v615_v54 }
  0xb9   : > { %v609_v53 = vpop.f32.mrf.mxu1 }
  0xbc   : > { %776 = vrot.lane.b32.xlu2 %v1611_v18, %s1454_s26 }
  0xc4   : > { %853 = vrot.lane.b32.xlu2 %v1611_v18, %s1455_s27 }
  0xcc   : > { %774 = vrot.lane.b32.xlu2 %v1611_v18, %s1456_s28 }
  0xd4   : > { %851 = vrot.lane.b32.xlu2 %v1611_v18, %s1457_s30 }
 0x10e   : > { %v682_v35 = vpop.permute.xlu2 %681 }
 0x116   : > { %v777_v36 = vpop.permute.xlu2 %776 }
 0x117   : > { %v782_v0 = vsel %vm623_vm1, %v777_v36, 0 }
 0x11e   : > { %v854_v37 = vpop.permute.xlu2 %853 }
 0x11f   : > { %v859_v38 = vsel %vm623_vm1, %v854_v37, 0 }
 0x120   : > { %868 = vmatpush.bf16.xpose.msra.mxu1 %v859_v38 }
 0x126   : > { %v622_v39 = vpop.permute.xlu0 %621  ;;  %v775_v1 = vpop.permute.xlu2 %774 }
 0x127   : > { %v628_v40 = vsel %vm623_vm1, %v622_v39, 0 }
 0x128   : > { %637 = vmatpush.bf16.xpose.msra.mxu2 %v628_v40 }
 0x12e   : > { %v852_v5 = vpop.permute.xlu2 %851 }
 0x12f   : > { %1198 = vmatmul.msk.bf16.vlgmr.msra.gmra.mxu2 %vm623_vm1, %v1611_v18 }
 0x1b2   : > { %v639_v41 = vpop.f32.mrf.mxu2 }
 0x1b3   : > { %v643_v43 = vmul.f32 0.25, %v639_v41 }
 0x1b5   : > { %v644_v44 = vadd.f32 %v643_v43, %v1631_v42 }
 0x1b7   : > { %v646_v45 = vsel %vm645_vm2, %v644_v44, -inf }
 0x1b8   : > { %647 = vmax.xlane.f32.xlu0 %v646_v45 }
 0x1ba   : > { %v641_v46 = vpop.f32.mrf.mxu2 }
 0x22b   : > { %v648_v47 = vpop.xlane.xlu0 %647 }
 0x22c   : > { %v649_v48 = vsub.f32 %v644_v44, %v648_v47 }
 0x22e   : > { %v650_v49 = vmul.f32 1.442695, %v649_v48 }
 0x230   : > { %1282 = vpow2.f32 %v650_v49 }
 0x236   : > { %v1283_v51 = vpop.eup %1282 }
 0x237   : > { %v652_v52 = vsel %vm645_vm2, %v1283_v51, 0.0 }
 0x238   : > { %653 = vadd.xlane.f32.xlu1 %v652_v52  ;;  %v614_v52 = vld [vmem:[#allocation4 + $0x18] sm:$0xff] }
 0x251   : > { %683 = vrot.lane.b32.xlu1 %v1611_v18, %s1458_s22  ;;  %s546_s22 = scalar_lea.vmem %s1742_s21, %s1594_s2 }
 0x2ab   : > { %v654_v58 = vpop.xlane.xlu1 %653 }
 0x2ac   : > { %1284 = vrcp.f32 %v654_v58 }
 0x2b2   : > { %v1285_v59 = vpop.eup %1284 }
 0x2b3   : > { %v656_v60 = vmul.f32 %v1285_v59, %v1283_v51  ;;  %v613_v51 = vld [vmem:[#allocation4 + $0x10] sm:$0xff] }
 0x2b4   : > { %v741_v53 = vpack.c.bf16 %v614_v52, %v613_v51 }
 0x2b5   : > { %v657_v61 = vpack.c.bf16 %v656_v60, %v656_v60 }
 0x2b6   : > { %752 = vmatpush.bf16.msrb.mxu0 %v741_v53  ;;  %v1012_v53 = vld [vmem:[#allocation7 + $0x28] sm:$0xff] }
 0x2b7   : > { %1199 = vmatmul.msk.bf16.vlgmr.msra.gmra.mxu3 %vm645_vm2, %v657_v61 }
 0x2ba   : > { %844 = vmatpush.bf16.msra.mxu0 %v833_v57 }
 0x2c3   : > { %v684_v62 = vpop.permute.xlu1 %683 }
 0x2c4   : > { %v689_v63 = vsel %vm623_vm1, %v684_v62, 0 }
 0x2c5   : > { %698 = vmatpush.bf16.xpose.msrb.mxu3 %v689_v63 }
 0x2cc   : > { %1200 = vmatmul.msk.bf16.vlgmr.msrb.gmra.mxu3 %vm623_vm1, %v682_v35 }
 0x2cd   : > { %791 = vmatpush.bf16.xpose.msra.mxu3 %v782_v0 }
 0x2dc   : > { %1204 = vmatmul.msk.bf16.vlgmr.msra.gmra.mxu3 %vm623_vm1, %v775_v1 }
 0x33a   : > { %v675_v2 = vpop.f32.mrf.mxu3 }
 0x33b   : > { %v679_v3 = vpack.c.bf16 %v675_v2, %v675_v2 }
 0x33d   : > { %1203 = vmatmul.msk.bf16.vlgmr.msrb.gmra.mxu1 %vm623_vm1, %v679_v3 }
 0x342   : > { %v677_v4 = vpop.f32.mrf.mxu3 }
 0x34d   : > { %1207 = vmatmul.msk.bf16.vlgmr.msra.gmra.mxu1 %vm623_vm1, %v852_v5  ;;  %v617_v5 = vld [vmem:[#allocation4 + $0x30] sm:$0xff] }
 0x34f   : > { %v700_v6 = vpop.f32.mrf.mxu3 }
 0x350   : > { %v704_v7 = vmul.f32 0.25, %v700_v6  ;;  %v618_v6 = vld [vmem:[#allocation4 + $0x38] sm:$0xff] }
 0x352   : > { %v705_v8 = vadd.f32 %v704_v7, %v1631_v42  ;;  %v910_v7 = vpack.c.bf16 %v618_v6, %v617_v5  ;;  %v1009_v6 = vld [vmem:[#allocation7 + $0x10] sm:$0xff] }
 0x354   : > { %v706_v9 = vsel %vm645_vm2, %v705_v8, -inf }
 0x355   : > { %707 = vmax.xlane.f32.xlu1 %v706_v9 }
 0x357   : > { %v702_v10 = vpop.f32.mrf.mxu3 }
 0x35f   : > { %v793_v11 = vpop.f32.mrf.mxu3 }
 0x360   : > { %v797_v13 = vmul.f32 0.25, %v793_v11 }
 0x362   : > { %v798_v14 = vadd.f32 %v797_v13, %v1631_v42 }
 0x364   : > { %v799_v15 = vsel %vm645_vm2, %v798_v14, -inf }
 0x365   : > { %800 = vmax.xlane.f32.xlu0 %v799_v15 }
 0x367   : > { %v795_v16 = vpop.f32.mrf.mxu3 }
 0x379   : > { %719 = vrot.lane.b32.xlu0 %v1638_v56, %s1452_s23 }
 0x3ba   : > { %v1655_v17 = vpop.f32.mrf.mxu1 }
 0x3c2   : > { %v772_v18 = vpop.f32.mrf.mxu1 }
 0x3c8   : > { %v708_v19 = vpop.xlane.xlu1 %707 }
 0x3c9   : > { %v709_v20 = vsub.f32 %v705_v8, %v708_v19  ;;  %v1275_v19 = vld [vmem:[%s1723_s5] ss:$0 sm:$0xff] }
 0x3ca   : > { %v870_v21 = vpop.f32.mrf.mxu1 }
 0x3cb   : > { %v710_v22 = vmul.f32 1.442695, %v709_v20  ;;  %v874_v23 = vmul.f32 0.25, %v870_v21 }
 0x3cd   : > { %1286 = vpow2.f32 %v710_v22  ;;  %v875_v24 = vadd.f32 %v874_v23, %v1631_v42 }
 0x3cf   : > { %v876_v25 = vsel %vm645_vm2, %v875_v24, -inf }
 0x3d0   : > { %877 = vmax.xlane.f32.xlu2 %v876_v25 }
 0x3d2   : > { %v872_v26 = vpop.f32.mrf.mxu1 }
 0x3d3   : > { %v1287_v27 = vpop.eup %1286 }
 0x3d4   : > { %v712_v28 = vsel %vm645_vm2, %v1287_v27, 0.0 }
 0x3d5   : > { %713 = vadd.xlane.f32.xlu0 %v712_v28 }
 0x3d8   : > { %v801_v29 = vpop.xlane.xlu0 %800 }
 0x3d9   : > { %v802_v30 = vsub.f32 %v798_v14, %v801_v29 }
 0x3db   : > { %v803_v31 = vmul.f32 1.442695, %v802_v30 }
 0x3dd   : > { %1288 = vpow2.f32 %v803_v31 }
 0x3e3   : > { %v1289_v32 = vpop.eup %1288 }
 0x3e4   : > { %v805_v33 = vsel %vm645_vm2, %v1289_v32, 0.0 }
 0x3e5   : > { %806 = vadd.xlane.f32.xlu2 %v805_v33 }
 0x3e9   : > { %811 = vrot.lane.b32.xlu0 %v1638_v56, %s1456_s28 }
 0x3eb   : > { %v720_v34 = vpop.permute.xlu0 %719 }
 0x3ec   : > { %v725_v35 = vsel %vm662_vm3, %v720_v34, 0 }
 0x3ed   : > { %734 = vmatpush.bf16.msrb.mxu2 %v725_v35 }
 0x443   : > { %v878_v36 = vpop.xlane.xlu2 %877 }
 0x444   : > { %v879_v37 = vsub.f32 %v875_v24, %v878_v36  ;;  %v979_v36 = vld [vmem:[#allocation6 + $0x30] sm:$0xff] }
 0x446   : > { %v880_v38 = vmul.f32 1.442695, %v879_v37  ;;  %v980_v37 = vld [vmem:[#allocation6 + $0x38] sm:$0xff] }
 0x448   : > { %1290 = vpow2.f32 %v880_v38  ;;  %v714_v39 = vpop.xlane.xlu0 %713  ;;  %v985_v38 = vpack.c.bf16 %v980_v37, %v979_v36 }
 0x449   : > { %1292 = vrcp.f32 %v714_v39  ;;  %v977_v39 = vld [vmem:[#allocation6 + $0x20] sm:$0xff] }
 0x44e   : > { %v1291_v40 = vpop.eup %1290 }
 0x44f   : > { %v1293_v41 = vpop.eup %1292  ;;  %v882_v42 = vsel %vm645_vm2, %v1291_v40, 0.0 }
 0x450   : > { %v716_v43 = vmul.f32 %v1293_v41, %v1287_v27  ;;  %883 = vadd.xlane.f32.xlu1 %v882_v42  ;;  %v975_v42 = vld [vmem:[#allocation6 + $0x10] sm:$0xff] }
 0x452   : > { %v717_v44 = vpack.c.bf16 %v716_v43, %v716_v43  ;;  %v976_v43 = vld [vmem:[#allocation6 + $0x18] sm:$0xff] }
 0x454   : > { %1201 = vmatmul.msk.bf16.vlgmr.msrb.gmra.mxu2 %vm645_vm2, %v717_v44  ;;  %v983_v44 = vpack.c.bf16 %v976_v43, %v975_v42 }
 0x458   : > { %v807_v45 = vpop.xlane.xlu2 %806 }
 0x459   : > { %1294 = vrcp.f32 %v807_v45  ;;  %v973_v45 = vld [vmem:[#allocation6] sm:$0xff] }
 0x45b   : > { %v812_v46 = vpop.permute.xlu0 %811 }
 0x45c   : > { %v817_v47 = vsel %vm662_vm3, %v812_v46, 0  ;;  %v974_v46 = vld [vmem:[#allocation6 + $0x8] sm:$0xff] }
 0x45d   : > { %826 = vmatpush.bf16.msra.mxu2 %v817_v47  ;;  %v982_v47 = vpack.c.bf16 %v974_v46, %v973_v45 }
 0x45f   : > { %v1295_v48 = vpop.eup %1294 }
 0x460   : > { %v809_v49 = vmul.f32 %v1295_v48, %v1289_v32  ;;  %v1013_v48 = vld [vmem:[#allocation7 + $0x30] sm:$0xff] }
 0x461   : > { %921 = vmatpush.bf16.msrb.mxu2 %v910_v7  ;;  %v1010_v7 = vld [vmem:[#allocation7 + $0x18] sm:$0xff] }
 0x462   : > { %v810_v50 = vpack.c.bf16 %v809_v49, %v809_v49  ;;  %v1014_v49 = vld [vmem:[#allocation7 + $0x38] sm:$0xff] }
 0x463   : > { %v1019_v52 = vpack.c.bf16 %v1014_v49, %v1013_v48 }
 0x464   : > { %1205 = vmatmul.msk.bf16.vlgmr.msra.gmra.mxu2 %vm645_vm2, %v810_v50  ;;  %v1011_v50 = vld [vmem:[#allocation7 + $0x20] sm:$0xff] }
 0x465   : > { %1031 = vmatpush.bf16.msrb.mxu1 %v1019_v52  ;;  %v1018_v55 = vpack.c.bf16 %v1012_v53, %v1011_v50 }
 0x469   : > { %888 = vrot.lane.b32.xlu1 %v1638_v56, %s1457_s30  ;;  %1032 = vmatpush.bf16.msrb.mxu1 %v1018_v55 }
 0x4c3   : > { %v884_v58 = vpop.xlane.xlu1 %883 }
 0x4c4   : > { %1296 = vrcp.f32 %v884_v58 }
 0x4ca   : > { %v1297_v59 = vpop.eup %1296 }
 0x4cb   : > { %v886_v62 = vmul.f32 %v1297_v59, %v1291_v40  ;;  %v978_v40 = vld [vmem:[#allocation6 + $0x28] sm:$0xff] }
 0x4cc   : > { %v984_v41 = vpack.c.bf16 %v978_v40, %v977_v39  ;;  %v1280_v39 = vld [vmem:[%s1730_s12] ss:$0 sm:$0xff] }
 0x4cd   : > { %v887_v56 = vpack.c.bf16 %v886_v62, %v886_v62 }
 0x4d7   : > { %v736_v60 = vpop.f32.mrf.mxu2 }
 0x4d8   : > { %v740_v61 = vpack.c.bf16 %v736_v60, %v736_v60 }
 0x4da   : > { %1202 = vmatmul.msk.bf16.vlgmr.msrb.gmra.mxu0 %vm623_vm1, %v740_v61 }
 0x4db   : > { %v889_v63 = vpop.permute.xlu1 %888  ;;  %997 = vmatpush.bf16.msrb.mxu0 %v985_v38 }
 0x4dc   : > { %v894_v0 = vsel %vm662_vm3, %v889_v63, 0 }
 0x4dd   : > { %903 = vmatpush.bf16.msrb.mxu3 %v894_v0  ;;  %v1276_v0 = vld [vmem:[%s1728_s10] ss:$0 sm:$0xff] }
 0x4df   : > { %v738_v1 = vpop.f32.mrf.mxu2  ;;  %998 = vmatpush.bf16.msrb.mxu0 %v984_v41 }
 0x4e0   : > { %1208 = vmatmul.msk.bf16.vlgmr.msrb.gmra.mxu3 %vm645_vm2, %v887_v56  ;;  %v1277_v1 = vld [vmem:[%s1729_s11] ss:$0 sm:$0xff] }
 0x4e3   : > { %999 = vmatpush.bf16.msrb.mxu0 %v983_v44 }
 0x4e7   : > { %v828_v2 = vpop.f32.mrf.mxu2  ;;  %1000 = vmatpush.bf16.msrb.mxu0 %v982_v47 }
 0x4e8   : > { %v832_v3 = vpack.c.bf16 %v828_v2, %v828_v2 }
 0x4ea   : > { %1206 = vmatmul.msk.bf16.vlgmr.msra.gmra.mxu0 %vm623_vm1, %v832_v3 }
 0x4ef   : > { %v830_v4 = vpop.f32.mrf.mxu2 }
 0x557   : > { %v754_v8 = vpop.f32.mrf.mxu0 }
 0x558   : > { %v771_v13 = vadd.f32 %v1655_v17, %v754_v8  ;;  %v1459_v17 = vmov 64.0   ;;  %v1017_v8 = vpack.c.bf16 %v1010_v7, %v1009_v6 }
 0x559   : > { %1298 = vrcp.f32 %v1459_v17 }
 0x55a   : > { %1033 = vmatpush.bf16.msrb.mxu1 %v1017_v8 }
 0x55f   : > { %v756_v9 = vpop.f32.mrf.mxu0  ;;  %v1299_v26 = vpop.eup %1298 }
 0x560   : > { %v940_v27 = vmul.f32 64.0, %v1299_v26  ;;  %vm944_vm4 = vweird.f32 %v1299_v26  ;;  %v1007_v9 = vld [vmem:[#allocation7] sm:$0xff] }
 0x562   : > { %v941_v28 = vsub.f32 1.0, %v940_v27 }
 0x563   : > { %v905_v10 = vpop.f32.mrf.mxu3 }
 0x564   : > { %v909_v11 = vpack.c.bf16 %v905_v10, %v905_v10  ;;  %v942_v29 = vmul.f32 %v1299_v26, %v941_v28  ;;  %v1008_v10 = vld [vmem:[#allocation7 + $0x8] sm:$0xff] }
 0x566   : > { %1209 = vmatmul.msk.bf16.vlgmr.msrb.gmra.mxu2 %vm623_vm1, %v909_v11  ;;  %v943_v30 = vadd.f32 %v1299_v26, %v942_v29  ;;  %v1016_v11 = vpack.c.bf16 %v1008_v10, %v1007_v9 }
 0x567   : > { %v846_v14 = vpop.f32.mrf.mxu0 }
 0x568   : > { %v850_v15 = vadd.f32 %v846_v14, %v771_v13  ;;  %v1681_v31 = vsel %vm944_vm4, %v1299_v26, %v943_v30  ;;  %1034 = vmatpush.bf16.msrb.mxu1 %v1016_v11  ;;  %v1278_v13 = vld [vmem:[%s1725_s7] ss:$0 sm:$0xff] }
 0x56b   : > { %v907_v16 = vpop.f32.mrf.mxu3 }
 0x56f   : > { %v848_v18 = vpop.f32.mrf.mxu0 }
 0x5e9   : > { %v923_v20 = vpop.f32.mrf.mxu2 }
 0x5ea   : > { %v927_v21 = vadd.f32 %v923_v20, %v850_v15  ;;  %v1279_v20 = vld [vmem:[%s1727_s9] ss:$0 sm:$0xff] }
 0x5ec   : > { %v932_v22 = vadd.f32 %v1275_v19, %v927_v21 }
 0x5ee   : > { %v933_v23 = vadd.f32 %v932_v22, %v1600_v12 }
 0x5f0   : > { %v936_v24 = vsel %vm581_vm0, %v933_v23, 0.0 }
 0x5f1   : > { %937 = vadd.xlane.f32.xlu2 %v936_v24  ;;  %v925_v25 = vpop.f32.mrf.mxu2 }
 0x664   : > { %v938_v32 = vpop.xlane.xlu2 %937 }
 0x665   : > { %v946_v33 = vmul.f32 %v1681_v31, %v938_v32 }
 0x667   : > { %v947_v34 = vsub.f32 %v933_v23, %v946_v33 }
 0x669   : > { %v948_v35 = vmul.f32 %v947_v34, %v947_v34 }
 0x66b   : > { %v949_v12 = vsel %vm581_vm0, %v948_v35, 0.0 }
 0x66c   : > { %950 = vadd.xlane.f32.xlu0 %v949_v12 }
 0x6df   : > { %v951_v51 = vpop.xlane.xlu0 %950 }
 0x6e0   : > { %v952_v54 = vmul.f32 %v951_v51, %v1681_v31 }
 0x6e2   : > { %v953_v57 = vadd.f32 1e-05, %v952_v54 }
 0x6e4   : > { %1300 = vrsqrt.f32 %v953_v57  ;;  %vm960_vm6 = vweird.f32 %v953_v57 }
 0x6ea   : > { %v1301_v58 = vpop.eup %1300 }
 0x6eb   : > { %v955_v59 = vmul.f32 %v1301_v58, %v953_v57  ;;  %vm961_vm5 = vweird.f32 %v1301_v58 }
 0x6ec   : > { %vm962_vm7 = vmor %vm960_vm6, %vm961_vm5 }
 0x6ed   : > { %v956_v60 = vmul.f32 %v1301_v58, %v955_v59 }
 0x6ef   : > { %v957_v61 = vmul.f32 0.5, %v956_v60 }
 0x6f1   : > { %v958_v62 = vsub.f32 1.5, %v957_v61 }
 0x6f3   : > { %v959_v63 = vmul.f32 %v1301_v58, %v958_v62 }
 0x6f5   : > { %v963_v56 = vsel %vm962_vm7, %v1301_v58, %v959_v63 }
 0x6f6   : > { %v964_v2 = vmul.f32 %v963_v56, %v947_v34 }
 0x6f8   : > { %v968_v3 = vmul.f32 %v1276_v0, %v964_v2 }
 0x6fa   : > { %v972_v4 = vadd.f32 %v1277_v1, %v968_v3 }
 0x6fc   : > { %v981_v5 = vpack.c.bf16 %v972_v4, %v972_v4 }
 0x6fe   : > { %1210 = vmatmul.msk.bf16.vlgmr.msrb.gmra.mxu0 %vm581_vm0, %v981_v5 }
 0x77b   : > { %v1002_v14 = vpop.f32.mrf.mxu0 }
 0x77c   : > { %v1003_v15 = vadd.f32 %v1278_v13, %v1002_v14 }
 0x77e   : > { %v1006_v16 = vmax.f32 %v1003_v15, 0.0 }
 0x780   : > { %v1015_v18 = vpack.c.bf16 %v1006_v16, %v1006_v16 }
 0x782   : > { %1211 = vmatmul.msk.bf16.vlgmr.msrb.gmra.mxu1 %vm581_vm0, %v1015_v18 }
 0x783   : > { %v1004_v19 = vpop.f32.mrf.mxu0 }
 0x7ff   : > { %v1036_v21 = vpop.f32.mrf.mxu1 }
 0x800   : > { %v1037_v22 = vadd.f32 %v1279_v20, %v1036_v21 }
 0x802   : > { %v1040_v23 = vadd.f32 %v1037_v22, %v972_v4 }
 0x804   : > { %v1043_v24 = vsel %vm581_vm0, %v1040_v23, 0.0 }
 0x805   : > { %1044 = vadd.xlane.f32.xlu2 %v1043_v24 }
 0x807   : > { %v1038_v25 = vpop.f32.mrf.mxu1 }
 0x878   : > { %v1045_v17 = vpop.xlane.xlu2 %1044 }
 0x879   : > { %v1046_v26 = vmul.f32 %v1045_v17, %v1681_v31 }
 0x87b   : > { %v1047_v27 = vsub.f32 %v1040_v23, %v1046_v26 }
 0x87d   : > { %v1048_v28 = vmul.f32 %v1047_v27, %v1047_v27 }
 0x87f   : > { %v1049_v29 = vsel %vm581_vm0, %v1048_v28, 0.0 }
 0x880   : > { %1050 = vadd.xlane.f32.xlu2 %v1049_v29 }
 0x8f3   : > { %v1051_v30 = vpop.xlane.xlu2 %1050 }
 0x8f4   : > { %v1052_v32 = vmul.f32 %v1051_v30, %v1681_v31  ;;  %v1281_v31 = vld [vmem:[%s1731_s13] ss:$0 sm:$0xff] }
 0x8f6   : > { %v1053_v33 = vadd.f32 1e-05, %v1052_v32 }
 0x8f8   : > { %1302 = vrsqrt.f32 %v1053_v33  ;;  %vm1060_vm9 = vweird.f32 %v1053_v33 }
 0x8fe   : > { %v1303_v34 = vpop.eup %1302 }
 0x8ff   : > { %v1055_v35 = vmul.f32 %v1303_v34, %v1053_v33  ;;  %vm1061_vm8 = vweird.f32 %v1303_v34 }
 0x900   : > { %vm1062_vm10 = vmor %vm1060_vm9, %vm1061_vm8 }
 0x901   : > { %v1056_v12 = vmul.f32 %v1303_v34, %v1055_v35 }
 0x903   : > { %v1057_v36 = vmul.f32 0.5, %v1056_v12 }
 0x905   : > { %v1058_v37 = vsub.f32 1.5, %v1057_v36 }
 0x907   : > { %v1059_v38 = vmul.f32 %v1303_v34, %v1058_v37 }
 0x909   : > { %v1063_v40 = vsel %vm1062_vm10, %v1303_v34, %v1059_v38 }
 0x90a   : > { %v1064_v41 = vmul.f32 %v1063_v40, %v1047_v27 }
 0x90c   : > { %v1068_v42 = vmul.f32 %v1280_v39, %v1064_v41 }
 0x90e   : > { %v1072_v43 = vadd.f32 %v1281_v31, %v1068_v42 }
 0x910   : > { %1073 = vst.msk [vmem:[%s546_s22] sm:$0xff] %vm581_vm0, %v1072_v43 }
 0x911 PF: > { %s1743_s25 = sld [smem:[#allocation12_spill]] }
 0x917   : > { %s27_s29 = sadd.s32 1, %s1743_s25  }
 0x918   : > { %p24_p7 = scmp.ge.s32.totalorder %s27_s29, 4  }
 0x91a   :  { %26 = sbr.rel (!%p24_p7) target bundleno = 7 (0x7), region = 126 }
 0x91f   :  { %1093 = vsyncpa [#allocation3], 1 }
 0x920   :  { %1095 = vsyncpa [#allocation3 + $0x1], 1 }
 0x921   :  { %1096 = vsyncpa [#allocation5], 1 }
 0x922   :  { %1097 = vsyncpa [#allocation8], 1 }

</bundles_post_ra>
